<compile_context>
chip_gen: v6e
topology: v6e:2x2x1
jax: 0.10.0
libtpu: 0.0.40
codegen_flags: <defaults>
</compile_context>

<pallas_src>
import functools

import jax
import jax.numpy as jnp
from jax.experimental import pallas as pl
from jax.experimental.pallas import tpu as pltpu

INPUT_DIM = 784
HIDDEN = 512
MAX_SINGLE = 128   # largest batch handled as one gridless tile
MAX_TILE = 512     # largest batch tile for the gridded path


def _round_up(v, m):
    return ((v + m - 1) // m) * m


def _bcvae_kernel(x_ref, noise_ref,
                  w1_ref, b1_ref, w2_ref, b2_ref,
                  w3_ref, b3_ref, w4_ref, b4_ref,
                  recon_ref, logits_ref, z_ref,
                  *, temperature, hard):
    # ---- encoder: Linear(784,512) -> ReLU -> Linear(512,latent) ----
    x = x_ref[...].astype(jnp.bfloat16)                      # cast in-kernel
    h1 = jnp.dot(x, w1_ref[...], preferred_element_type=jnp.float32) + b1_ref[...]
    h1 = jnp.maximum(h1, 0.0).astype(jnp.bfloat16)
    logits = jnp.dot(h1, w2_ref[...], preferred_element_type=jnp.float32) + b2_ref[...]
    logits_ref[...] = logits.astype(jnp.bfloat16)

    # ---- binary concrete reparameterization (logistic noise from wrapper) ----
    a = logits + noise_ref[...]
    if hard:
        # sigmoid(a/T) > 0.5  <=>  a > 0  for T > 0 (skip the exp entirely).
        # TODO(synk): straight-through gradient (y_hard - stop_grad(y_soft) + y_soft)
        # needs a custom_vjp; this kernel implements the forward value only.
        z = (a > 0.0).astype(jnp.float32)
    else:
        z = jax.nn.sigmoid(a * (1.0 / temperature))
    z_ref[...] = z.astype(jnp.bfloat16)

    # ---- decoder: Linear(latent,512) -> ReLU -> Linear(512,784) -> Sigmoid ----
    zb = z.astype(jnp.bfloat16)
    h2 = jnp.dot(zb, w3_ref[...], preferred_element_type=jnp.float32) + b3_ref[...]
    h2 = jnp.maximum(h2, 0.0).astype(jnp.bfloat16)
    out = jnp.dot(h2, w4_ref[...], preferred_element_type=jnp.float32) + b4_ref[...]
    recon_ref[...] = jax.nn.sigmoid(out).astype(jnp.bfloat16)


def init_params(key, input_dim, latent_dim):
    """Synthetic params: bf16 weights [in,out], f32 biases [1,out]."""
    ks = jax.random.split(key, 8)

    def lin(kw, kb, fan_in, fan_out):
        lim = 1.0 / (fan_in ** 0.5)
        w = jax.random.uniform(kw, (fan_in, fan_out), jnp.float32, -lim, lim)
        b = jax.random.uniform(kb, (1, fan_out), jnp.float32, -lim, lim)
        return w.astype(jnp.bfloat16), b

    w1, b1 = lin(ks[0], ks[1], input_dim, HIDDEN)
    w2, b2 = lin(ks[2], ks[3], HIDDEN, latent_dim)
    w3, b3 = lin(ks[4], ks[5], latent_dim, HIDDEN)
    w4, b4 = lin(ks[6], ks[7], HIDDEN, input_dim)
    return (w1, b1, w2, b2, w3, b3, w4, b4)


def binary_cvae_forward(x, params, seed, temperature=1.0, training=False):
    """x: anything that flattens to [-1, 784]. Returns (recon, logits, z) in bf16."""
    x2d = x.reshape(-1, INPUT_DIM).astype(jnp.float32)
    B = x2d.shape[0]
    w1, b1, w2, b2, w3, b3, w4, b4 = params
    latent = w2.shape[1]

    # Logistic noise generated once outside the kernel (works on all backends,
    # incl. interpret mode).  Single draw: log(u) - log1p(-u) ~ Logistic(0,1).
    key = jax.random.PRNGKey(seed)
    u = jax.random.uniform(key, (B, latent), jnp.float32, 1e-6, 1.0 - 1e-6)
    noise = jnp.log(u) - jnp.log1p(-u)

    # Batch tiling: gridless single tile for small batch, else large tiles with
    # grid length >= 2 so both v7x TensorCores get work.
    if B <= MAX_SINGLE:
        b_pad = _round_up(B, 8)
        grid = None
        tm = b_pad
    else:
        tm = min(MAX_TILE, _round_up(pl.cdiv(B, 2), 128))
        b_pad = _round_up(B, tm)
        grid = (b_pad // tm,)

    if b_pad != B:
        x2d = jnp.pad(x2d, ((0, b_pad - B), (0, 0)))
        noise = jnp.pad(noise, ((0, b_pad - B), (0, 0)))

    kernel = functools.partial(_bcvae_kernel,
                               temperature=float(temperature),
                               hard=bool(training))

    out_shape = (
        jax.ShapeDtypeStruct((b_pad, INPUT_DIM), jnp.bfloat16),
        jax.ShapeDtypeStruct((b_pad, latent), jnp.bfloat16),
        jax.ShapeDtypeStruct((b_pad, latent), jnp.bfloat16),
    )
    operands = (x2d, noise, w1, b1, w2, b2, w3, b3, w4, b4)

    if grid is None:
        # Single tile: gridless call, every operand is a whole-array VMEM block.
        in_specs = [pl.BlockSpec(memory_space=pltpu.MemorySpace.VMEM)] * 10
        out_specs = tuple(pl.BlockSpec(memory_space=pltpu.MemorySpace.VMEM)
                          for _ in range(3))
        recon, logits, z = pl.pallas_call(
            kernel,
            out_shape=out_shape,
            in_specs=in_specs,
            out_specs=out_specs,
        )(*operands)
    else:
        # Batch-tiled grid; weights stay VMEM-resident (constant index_map).
        def _const2d(i):
            return (0, 0)

        in_specs = [
            pl.BlockSpec((tm, INPUT_DIM), lambda i: (i, 0)),   # x tile (f32)
            pl.BlockSpec((tm, latent), lambda i: (i, 0)),      # logistic noise
            pl.BlockSpec(w1.shape, _const2d), pl.BlockSpec(b1.shape, _const2d),
            pl.BlockSpec(w2.shape, _const2d), pl.BlockSpec(b2.shape, _const2d),
            pl.BlockSpec(w3.shape, _const2d), pl.BlockSpec(b3.shape, _const2d),
            pl.BlockSpec(w4.shape, _const2d), pl.BlockSpec(b4.shape, _const2d),
        ]
        out_specs = (
            pl.BlockSpec((tm, INPUT_DIM), lambda i: (i, 0)),
            pl.BlockSpec((tm, latent), lambda i: (i, 0)),
            pl.BlockSpec((tm, latent), lambda i: (i, 0)),
        )
        recon, logits, z = pl.pallas_call(
            kernel,
            out_shape=out_shape,
            grid=grid,
            in_specs=in_specs,
            out_specs=out_specs,
            compiler_params=pltpu.CompilerParams(
                dimension_semantics=("parallel",)),
        )(*operands)

    if b_pad != B:
        recon, logits, z = recon[:B], logits[:B], z[:B]
    return recon, logits, z


def _reference(x_bf, z, params):
    """Pure-JAX mirror of the kernel math (bf16 inputs, f32 accumulate),
    using the kernel's own z sample."""
    w1, b1, w2, b2, w3, b3, w4, b4 = params
    f32 = jnp.float32
    h1 = jnp.maximum(jnp.dot(x_bf, w1, preferred_element_type=f32) + b1, 0.0)
    logits = jnp.dot(h1.astype(jnp.bfloat16), w2, preferred_element_type=f32) + b2
    h2 = jnp.maximum(
        jnp.dot(z.astype(jnp.bfloat16), w3, preferred_element_type=f32) + b3, 0.0)
    recon = jax.nn.sigmoid(
        jnp.dot(h2.astype(jnp.bfloat16), w4, preferred_element_type=f32) + b4)
    return logits, recon


if __name__ == "__main__":
    LATENT_DIM = 32
    BATCH = 16
    TOL = dict(atol=2e-2, rtol=2e-2)   # bf16 output storage

    key = jax.random.PRNGKey(0)
    k_x, k_p, k_x2 = jax.random.split(key, 3)

    # NCHW input like MNIST: [B, 1, 28, 28] (forward views it as [-1, 784]).
    x = jax.random.uniform(k_x, (BATCH, 1, 28, 28), jnp.float32)
    params = init_params(k_p, INPUT_DIM, LATENT_DIM)

    # ---- eval mode (soft binary-concrete sample), gridless single-tile path ----
    recon, logits, z = binary_cvae_forward(x, params, seed=42,
                                           temperature=0.7, training=False)
    jax.block_until_ready((recon, logits, z))
    assert recon.shape == (BATCH, INPUT_DIM) and logits.shape == (BATCH, LATENT_DIM)
    x_bf = x.reshape(-1, INPUT_DIM).astype(jnp.bfloat16)
    ref_logits, ref_recon = _reference(x_bf, z, params)
    assert bool(jnp.all(jnp.isfinite(recon.astype(jnp.float32))))
    assert bool(jnp.all(jnp.isfinite(logits.astype(jnp.float32))))
    assert jnp.allclose(logits.astype(jnp.float32), ref_logits, **TOL)
    assert jnp.allclose(recon.astype(jnp.float32), ref_recon, **TOL)
    zf = z.astype(jnp.float32)
    assert bool(jnp.all((zf >= 0.0) & (zf <= 1.0)))

    # ---- training mode (hard straight-through forward value) ----
    recon_h, logits_h, z_h = binary_cvae_forward(x, params, seed=7,
                                                 temperature=0.7, training=True)
    jax.block_until_ready((recon_h, logits_h, z_h))
    ref_logits_h, ref_recon_h = _reference(x_bf, z_h, params)
    assert jnp.allclose(logits_h.astype(jnp.float32), ref_logits_h, **TOL)
    assert jnp.allclose(recon_h.astype(jnp.float32), ref_recon_h, **TOL)
    zhf = z_h.astype(jnp.float32)
    assert bool(jnp.all((zhf == 0.0) | (zhf == 1.0)))

    # ---- larger batch exercises the batch-tiled "parallel" grid path ----
    BIG = 256
    xb = jax.random.uniform(k_x2, (BIG, INPUT_DIM), jnp.float32)
    recon_b, logits_b, z_b = binary_cvae_forward(xb, params, seed=123,
                                                 temperature=1.0, training=False)
    jax.block_until_ready((recon_b, logits_b, z_b))
    assert recon_b.shape == (BIG, INPUT_DIM) and logits_b.shape == (BIG, LATENT_DIM)
    ref_logits_b, ref_recon_b = _reference(xb.astype(jnp.bfloat16), z_b, params)
    assert jnp.allclose(logits_b.astype(jnp.float32), ref_logits_b, **TOL)
    assert jnp.allclose(recon_b.astype(jnp.float32), ref_recon_b, **TOL)

    print("KERNEL_OK")
</pallas_src>

<mosaic_0001>
module attributes {stable_mosaic.version = 11 : i64} {
  func.func @_bcvae_kernel(%arg0: memref<16x784xf32, #tpu.memory_space<vmem>>, %arg1: memref<16x32xf32, #tpu.memory_space<vmem>>, %arg2: memref<784x512xbf16, #tpu.memory_space<vmem>>, %arg3: memref<1x512xf32, #tpu.memory_space<vmem>>, %arg4: memref<512x32xbf16, #tpu.memory_space<vmem>>, %arg5: memref<1x32xf32, #tpu.memory_space<vmem>>, %arg6: memref<32x512xbf16, #tpu.memory_space<vmem>>, %arg7: memref<1x512xf32, #tpu.memory_space<vmem>>, %arg8: memref<512x784xbf16, #tpu.memory_space<vmem>>, %arg9: memref<1x784xf32, #tpu.memory_space<vmem>>, %arg10: memref<16x784xbf16, #tpu.memory_space<vmem>>, %arg11: memref<16x32xbf16, #tpu.memory_space<vmem>>, %arg12: memref<16x32xbf16, #tpu.memory_space<vmem>>) attributes {dimension_semantics = [], scalar_prefetch = 0 : i64, scratch_operands = 0 : i64, tpu.core_type = #tpu.core_type<tc>} {
    %c0 = arith.constant 0 : index
    %c0_0 = arith.constant 0 : index
    %0 = vector.load %arg0[%c0, %c0_0] : memref<16x784xf32, #tpu.memory_space<vmem>>, vector<16x784xf32>
    %1 = arith.truncf %0 : vector<16x784xf32> to vector<16x784xbf16>
    %c0_1 = arith.constant 0 : index
    %c0_2 = arith.constant 0 : index
    %2 = vector.load %arg2[%c0_1, %c0_2] : memref<784x512xbf16, #tpu.memory_space<vmem>>, vector<784x512xbf16>
    %cst = arith.constant dense<0.000000e+00> : vector<16x512xf32>
    %3 = tpu.matmul %1, %2, %cst {dimension_numbers = #tpu.dot_dimension_numbers<[1], [0], [0], [1], [0, 0, 1, 1], [], []>} : vector<16x784xbf16>, vector<784x512xbf16>, vector<16x512xf32> -> vector<16x512xf32>
    %c0_3 = arith.constant 0 : index
    %c0_4 = arith.constant 0 : index
    %4 = vector.load %arg3[%c0_3, %c0_4] : memref<1x512xf32, #tpu.memory_space<vmem>>, vector<1x512xf32>
    %5 = vector.broadcast %4 : vector<1x512xf32> to vector<16x512xf32>
    %6 = arith.addf %3, %5 : vector<16x512xf32>
    %cst_5 = arith.constant 0.000000e+00 : f32
    %7 = vector.broadcast %cst_5 : f32 to vector<16x512xf32>
    %8 = arith.maximumf %6, %7 : vector<16x512xf32>
    %9 = arith.truncf %8 : vector<16x512xf32> to vector<16x512xbf16>
    %c0_6 = arith.constant 0 : index
    %c0_7 = arith.constant 0 : index
    %10 = vector.load %arg4[%c0_6, %c0_7] : memref<512x32xbf16, #tpu.memory_space<vmem>>, vector<512x32xbf16>
    %cst_8 = arith.constant dense<0.000000e+00> : vector<16x32xf32>
    %11 = tpu.matmul %9, %10, %cst_8 {dimension_numbers = #tpu.dot_dimension_numbers<[1], [0], [0], [1], [0, 0, 1, 1], [], []>} : vector<16x512xbf16>, vector<512x32xbf16>, vector<16x32xf32> -> vector<16x32xf32>
    %c0_9 = arith.constant 0 : index
    %c0_10 = arith.constant 0 : index
    %12 = vector.load %arg5[%c0_9, %c0_10] : memref<1x32xf32, #tpu.memory_space<vmem>>, vector<1x32xf32>
    %13 = vector.broadcast %12 : vector<1x32xf32> to vector<16x32xf32>
    %14 = arith.addf %11, %13 : vector<16x32xf32>
    %15 = arith.truncf %14 : vector<16x32xf32> to vector<16x32xbf16>
    %c0_11 = arith.constant 0 : index
    %c0_12 = arith.constant 0 : index
    %16 = vector.load %arg11[%c0_11, %c0_12] : memref<16x32xbf16, #tpu.memory_space<vmem>>, vector<16x32xbf16>
    tpu.vector_store %arg11[%c0_11, %c0_12], %15 {strides = array<i32>} : memref<16x32xbf16, #tpu.memory_space<vmem>>, vector<16x32xbf16>,
    %c0_13 = arith.constant 0 : index
    %c0_14 = arith.constant 0 : index
    %17 = vector.load %arg1[%c0_13, %c0_14] : memref<16x32xf32, #tpu.memory_space<vmem>>, vector<16x32xf32>
    %18 = arith.addf %14, %17 : vector<16x32xf32>
    %cst_15 = arith.constant 1.42857146 : f32
    %19 = vector.broadcast %cst_15 : f32 to vector<16x32xf32>
    %20 = arith.mulf %18, %19 : vector<16x32xf32>
    %21 = arith.negf %20 : vector<16x32xf32>
    %22 = math.exp %21 : vector<16x32xf32>
    %cst_16 = arith.constant 1.000000e+00 : f32
    %23 = vector.broadcast %cst_16 : f32 to vector<16x32xf32>
    %24 = arith.addf %23, %22 : vector<16x32xf32>
    %25 = arith.divf %23, %24 : vector<16x32xf32>
    %26 = arith.truncf %25 : vector<16x32xf32> to vector<16x32xbf16>
    %c0_17 = arith.constant 0 : index
    %c0_18 = arith.constant 0 : index
    %27 = vector.load %arg12[%c0_17, %c0_18] : memref<16x32xbf16, #tpu.memory_space<vmem>>, vector<16x32xbf16>
    tpu.vector_store %arg12[%c0_17, %c0_18], %26 {strides = array<i32>} : memref<16x32xbf16, #tpu.memory_space<vmem>>, vector<16x32xbf16>,
    %28 = arith.truncf %25 : vector<16x32xf32> to vector<16x32xbf16>
    %c0_19 = arith.constant 0 : index
    %c0_20 = arith.constant 0 : index
    %29 = vector.load %arg6[%c0_19, %c0_20] : memref<32x512xbf16, #tpu.memory_space<vmem>>, vector<32x512xbf16>
    %cst_21 = arith.constant dense<0.000000e+00> : vector<16x512xf32>
    %30 = tpu.matmul %28, %29, %cst_21 {dimension_numbers = #tpu.dot_dimension_numbers<[1], [0], [0], [1], [0, 0, 1, 1], [], []>} : vector<16x32xbf16>, vector<32x512xbf16>, vector<16x512xf32> -> vector<16x512xf32>
    %c0_22 = arith.constant 0 : index
    %c0_23 = arith.constant 0 : index
    %31 = vector.load %arg7[%c0_22, %c0_23] : memref<1x512xf32, #tpu.memory_space<vmem>>, vector<1x512xf32>
    %32 = vector.broadcast %31 : vector<1x512xf32> to vector<16x512xf32>
    %33 = arith.addf %30, %32 : vector<16x512xf32>
    %cst_24 = arith.constant 0.000000e+00 : f32
    %34 = vector.broadcast %cst_24 : f32 to vector<16x512xf32>
    %35 = arith.maximumf %33, %34 : vector<16x512xf32>
    %36 = arith.truncf %35 : vector<16x512xf32> to vector<16x512xbf16>
    %c0_25 = arith.constant 0 : index
    %c0_26 = arith.constant 0 : index
    %37 = vector.load %arg8[%c0_25, %c0_26] : memref<512x784xbf16, #tpu.memory_space<vmem>>, vector<512x784xbf16>
    %cst_27 = arith.constant dense<0.000000e+00> : vector<16x784xf32>
    %38 = tpu.matmul %36, %37, %cst_27 {dimension_numbers = #tpu.dot_dimension_numbers<[1], [0], [0], [1], [0, 0, 1, 1], [], []>} : vector<16x512xbf16>, vector<512x784xbf16>, vector<16x784xf32> -> vector<16x784xf32>
    %c0_28 = arith.constant 0 : index
    %c0_29 = arith.constant 0 : index
    %39 = vector.load %arg9[%c0_28, %c0_29] : memref<1x784xf32, #tpu.memory_space<vmem>>, vector<1x784xf32>
    %40 = vector.broadcast %39 : vector<1x784xf32> to vector<16x784xf32>
    %41 = arith.addf %38, %40 : vector<16x784xf32>
    %42 = arith.negf %41 : vector<16x784xf32>
    %43 = math.exp %42 : vector<16x784xf32>
    %cst_30 = arith.constant 1.000000e+00 : f32
    %44 = vector.broadcast %cst_30 : f32 to vector<16x784xf32>
    %45 = arith.addf %44, %43 : vector<16x784xf32>
    %46 = arith.divf %44, %45 : vector<16x784xf32>
    %47 = arith.truncf %46 : vector<16x784xf32> to vector<16x784xbf16>
    %c0_31 = arith.constant 0 : index
    %c0_32 = arith.constant 0 : index
    %48 = vector.load %arg10[%c0_31, %c0_32] : memref<16x784xbf16, #tpu.memory_space<vmem>>, vector<16x784xbf16>
    tpu.vector_store %arg10[%c0_31, %c0_32], %47 {strides = array<i32>} : memref<16x784xbf16, #tpu.memory_space<vmem>>, vector<16x784xbf16>,
    return
  }
}

</mosaic_0001>

<bundles_post_ra>
// kernel: tpu_custom_call.1
= control target key start
LH: loop header
LB: loop body
LE: loop exit
PB: predicated region body
PF: predicated region fallthrough
CT: control target
= control target key end

     0   :  { %18 = vsyncpa [#allocation3], 0  ;;  %vm1260_vm0 = vcmask 130048   ;;  %s7154_s0 = inlined_call_operand.vmem [shape: f32[16,784], index: 0, kind: input, shape index: {}]   ;;  %s7155_s1 = inlined_call_operand.vmem [shape: f32[16,32], index: 1, kind: input, shape index: {}]   ;;  %s7156_s2 = inlined_call_operand.vmem [shape: bf16[784,512], index: 2, kind: input, shape index: {}]   ;;  %s7157_s3 = inlined_call_operand.vmem [shape: f32[1,512], index: 3, kind: input, shape index: {}]   ;;  %s7158_s4 = inlined_call_operand.vmem [shape: bf16[512,32], index: 4, kind: input, shape index: {}]   ;;  %s7159_s5 = inlined_call_operand.vmem [shape: f32[1,32], index: 5, kind: input, shape index: {}]   ;;  %s7160_s6 = inlined_call_operand.vmem [shape: bf16[32,512], index: 6, kind: input, shape index: {}]   ;;  %s7161_s7 = inlined_call_operand.vmem [shape: f32[1,512], index: 7, kind: input, shape index: {}]   ;;  %s7162_s8 = inlined_call_operand.vmem [shape: bf16[512,784], index: 8, kind: input, shape index: {}]   ;;  %s7163_s9 = inlined_call_operand.vmem [shape: f32[1,784], index: 9, kind: input, shape index: {}]   ;;  %s7164_s10 = inlined_call_operand.hbm [shape: bf16[16,784], index: 10, kind: output, shape index: {0}]   ;;  %s7165_s11 = inlined_call_operand.hbm [shape: bf16[16,32], index: 11, kind: output, shape index: {1}]   ;;  %s7166_s12 = inlined_call_operand.hbm [shape: bf16[16,32], index: 12, kind: output, shape index: {2}]  }
   0x1   :  { %v4746_v0 = vld [vmem:[%s7156_s2 + $0xe4] ss:$16 sps:$4 sm:$0xff]   ;;  %v4750_v2 = vld [vmem:[%s7156_s2 + $0xe0] ss:$16 sps:$4 sm:$0xff]   ;;  %v42_v46 = vld [vmem:[%s7154_s0 + $0x8] sm:$0xff] }
   0x2   :  { %v4748_v1 = vld [vmem:[%s7156_s2 + $0x2e4] ss:$16 sps:$4 sm:$0xff]   ;;  %1264 = vmatprep.subr.bf16.mxu0 %v4746_v0  ;;  %v4751_v3 = vld [vmem:[%s7156_s2 + $0x2e0] ss:$16 sps:$4 sm:$0xff]   ;;  %v44_v48 = vld [vmem:[%s7154_s0 + $0x18] sm:$0xff] }
   0x3   :  { %1307 = vmatprep.subr.bf16.mxu1 %v4748_v1  ;;  %v4752_v4 = vld [vmem:[%s7156_s2 + $0xc4] ss:$16 sps:$4 sm:$0xff]   ;;  %1265 = vmatpush1.bf16.msra.mxu0 %v4750_v2  ;;  %v4756_v6 = vld [vmem:[%s7156_s2 + $0xc0] ss:$16 sps:$4 sm:$0xff]  }
   0x4   :  { %1308 = vmatpush1.bf16.msra.mxu1 %v4751_v3  ;;  %v4754_v5 = vld [vmem:[%s7156_s2 + $0x2c4] ss:$16 sps:$4 sm:$0xff]   ;;  %1266 = vmatprep.subr.bf16.mxu0 %v4752_v4  ;;  %v4757_v7 = vld [vmem:[%s7156_s2 + $0x2c0] ss:$16 sps:$4 sm:$0xff]  }
   0x5   :  { %1309 = vmatprep.subr.bf16.mxu1 %v4754_v5  ;;  %v4758_v8 = vld [vmem:[%s7156_s2 + $0xa4] ss:$16 sps:$4 sm:$0xff]   ;;  %v4762_v10 = vld [vmem:[%s7156_s2 + $0xa0] ss:$16 sps:$4 sm:$0xff]  }
   0x6   :  { %v4760_v9 = vld [vmem:[%s7156_s2 + $0x2a4] ss:$16 sps:$4 sm:$0xff]   ;;  %v4763_v11 = vld [vmem:[%s7156_s2 + $0x2a0] ss:$16 sps:$4 sm:$0xff]  }
   0x7   :  { %1267 = vmatpush1.bf16.msra.mxu0 %v4756_v6  ;;  %v4764_v12 = vld [vmem:[%s7156_s2 + $0x84] ss:$16 sps:$4 sm:$0xff]   ;;  %v4768_v14 = vld [vmem:[%s7156_s2 + $0x80] ss:$16 sps:$4 sm:$0xff]  }
   0x8   :  { %1310 = vmatpush1.bf16.msra.mxu1 %v4757_v7  ;;  %1268 = vmatprep.subr.bf16.mxu0 %v4758_v8  ;;  %v4766_v13 = vld [vmem:[%s7156_s2 + $0x284] ss:$16 sps:$4 sm:$0xff]   ;;  %v4769_v15 = vld [vmem:[%s7156_s2 + $0x280] ss:$16 sps:$4 sm:$0xff]   ;;  %v48_v7 = vld [vmem:[%s7154_s0 + $0x38] sm:$0xff] }
   0x9   :  { %1311 = vmatprep.subr.bf16.mxu1 %v4760_v9  ;;  %v4770_v16 = vld [vmem:[%s7156_s2 + $0x64] ss:$16 sps:$4 sm:$0xff]   ;;  %v4774_v18 = vld [vmem:[%s7156_s2 + $0x60] ss:$16 sps:$4 sm:$0xff]   ;;  %v50_v9 = vld [vmem:[%s7154_s0 + $0x48] sm:$0xff] }
   0xa   :  { %v4772_v17 = vld [vmem:[%s7156_s2 + $0x264] ss:$16 sps:$4 sm:$0xff]   ;;  %v4775_v19 = vld [vmem:[%s7156_s2 + $0x260] ss:$16 sps:$4 sm:$0xff]  }
   0xb   :  { %1269 = vmatpush1.bf16.msra.mxu0 %v4762_v10  ;;  %v4776_v20 = vld [vmem:[%s7156_s2 + $0x44] ss:$16 sps:$4 sm:$0xff]   ;;  %v4780_v22 = vld [vmem:[%s7156_s2 + $0x40] ss:$16 sps:$4 sm:$0xff]  }
   0xc   :  { %1312 = vmatpush1.bf16.msra.mxu1 %v4763_v11  ;;  %1270 = vmatprep.subr.bf16.mxu0 %v4764_v12  ;;  %v4778_v21 = vld [vmem:[%s7156_s2 + $0x244] ss:$16 sps:$4 sm:$0xff]   ;;  %v4781_v23 = vld [vmem:[%s7156_s2 + $0x240] ss:$16 sps:$4 sm:$0xff]  }
   0xd   :  { %1313 = vmatprep.subr.bf16.mxu1 %v4766_v13  ;;  %v4782_v24 = vld [vmem:[%s7156_s2 + $0x24] ss:$16 sps:$4 sm:$0xff]   ;;  %v4786_v26 = vld [vmem:[%s7156_s2 + $0x20] ss:$16 sps:$4 sm:$0xff]  }
   0xe   :  { %v4784_v25 = vld [vmem:[%s7156_s2 + $0x224] ss:$16 sps:$4 sm:$0xff]   ;;  %v4787_v27 = vld [vmem:[%s7156_s2 + $0x220] ss:$16 sps:$4 sm:$0xff]  }
   0xf   :  { %1271 = vmatpush1.bf16.msra.mxu0 %v4768_v14  ;;  %v4788_v28 = vld [vmem:[%s7156_s2 + $0x4] ss:$16 sps:$4 sm:$0xff]   ;;  %v4792_v30 = vld [vmem:[%s7156_s2] ss:$16 sps:$4 sm:$0xff]  }
  0x10   :  { %1314 = vmatpush1.bf16.msra.mxu1 %v4769_v15  ;;  %1272 = vmatprep.subr.bf16.mxu0 %v4770_v16  ;;  %v4790_v29 = vld [vmem:[%s7156_s2 + $0x204] ss:$16 sps:$4 sm:$0xff]   ;;  %v4793_v31 = vld [vmem:[%s7156_s2 + $0x200] ss:$16 sps:$4 sm:$0xff]  }
  0x11   :  { %1315 = vmatprep.subr.bf16.mxu1 %v4772_v17  ;;  %v4794_v32 = vld [vmem:[%s7156_s2 + $0x1e4] ss:$16 sps:$4 sm:$0xff]   ;;  %v4798_v34 = vld [vmem:[%s7156_s2 + $0x1e0] ss:$16 sps:$4 sm:$0xff]   ;;  %v4853_v17 = vld [vmem:[%s7156_s2 + $0xec] ss:$16 sps:$4 sm:$0xff]  }
  0x12   :  { %v4796_v33 = vld [vmem:[%s7156_s2 + $0x3e4] ss:$16 sps:$4 sm:$0xff]   ;;  %v4799_v35 = vld [vmem:[%s7156_s2 + $0x3e0] ss:$16 sps:$4 sm:$0xff]  }
  0x13   :  { %1273 = vmatpush1.bf16.msra.mxu0 %v4774_v18  ;;  %v4800_v36 = vld [vmem:[%s7156_s2 + $0x1c4] ss:$16 sps:$4 sm:$0xff]   ;;  %v4804_v38 = vld [vmem:[%s7156_s2 + $0x1c0] ss:$16 sps:$4 sm:$0xff]  }
  0x14   :  { %1316 = vmatpush1.bf16.msra.mxu1 %v4775_v19  ;;  %1274 = vmatprep.subr.bf16.mxu0 %v4776_v20  ;;  %v4802_v37 = vld [vmem:[%s7156_s2 + $0x3c4] ss:$16 sps:$4 sm:$0xff]   ;;  %v4805_v39 = vld [vmem:[%s7156_s2 + $0x3c0] ss:$16 sps:$4 sm:$0xff]   ;;  %v54_v20 = vld [vmem:[%s7154_s0 + $0x68] sm:$0xff] }
  0x15   :  { %1317 = vmatprep.subr.bf16.mxu1 %v4778_v21  ;;  %v4806_v40 = vld [vmem:[%s7156_s2 + $0x1a4] ss:$16 sps:$4 sm:$0xff]   ;;  %v4810_v42 = vld [vmem:[%s7156_s2 + $0x1a0] ss:$16 sps:$4 sm:$0xff]   ;;  %v5532_v21 = vmov 0  }
  0x16   :  { %v4808_v41 = vld [vmem:[%s7156_s2 + $0x3a4] ss:$16 sps:$4 sm:$0xff]   ;;  %v4811_v43 = vld [vmem:[%s7156_s2 + $0x3a0] ss:$16 sps:$4 sm:$0xff]  }
  0x17   :  { %1275 = vmatpush1.bf16.msra.mxu0 %v4780_v22  ;;  %v4812_v44 = vld [vmem:[%s7156_s2 + $0x184] ss:$16 sps:$4 sm:$0xff]   ;;  %v4816_v50 = vld [vmem:[%s7156_s2 + $0x180] ss:$16 sps:$4 sm:$0xff]  }
  0x18   :  { %1318 = vmatpush1.bf16.msra.mxu1 %v4781_v23  ;;  %1276 = vmatprep.subr.bf16.mxu0 %v4782_v24  ;;  %v4814_v45 = vld [vmem:[%s7156_s2 + $0x384] ss:$16 sps:$4 sm:$0xff]   ;;  %v4817_v51 = vld [vmem:[%s7156_s2 + $0x380] ss:$16 sps:$4 sm:$0xff]   ;;  %v4851_v24 = vld [vmem:[%s7156_s2 + $0xe8] ss:$16 sps:$4 sm:$0xff]  }
  0x19   :  { %1319 = vmatprep.subr.bf16.mxu1 %v4784_v25  ;;  %v49_v47 = vld [vmem:[%s7154_s0 + $0x40] sm:$0xff]  ;;  %v51_v49 = vld [vmem:[%s7154_s0 + $0x50] sm:$0xff] }
  0x1a   :  { %v4818_v52 = vld [vmem:[%s7156_s2 + $0x164] ss:$16 sps:$4 sm:$0xff]   ;;  %v5764_v53 = vpack.c.bf16 %v49_v47, %v42_v46  ;;  %v5766_v54 = vpack.c.bf16 %v51_v49, %v44_v48  ;;  %v4822_v56 = vld [vmem:[%s7156_s2 + $0x160] ss:$16 sps:$4 sm:$0xff]   ;;  %v4881_v47 = vld [vmem:[%s7156_s2 + $0x48] ss:$16 sps:$4 sm:$0xff]  }
  0x1b   :  { %1277 = vmatpush1.bf16.msra.mxu0 %v4786_v26  ;;  %v4820_v55 = vld [vmem:[%s7156_s2 + $0x364] ss:$16 sps:$4 sm:$0xff]   ;;  %v4823_v57 = vld [vmem:[%s7156_s2 + $0x360] ss:$16 sps:$4 sm:$0xff]   ;;  %v4859_v26 = vld [vmem:[%s7156_s2 + $0xcc] ss:$16 sps:$4 sm:$0xff]  }
  0x1c   :  { %1320 = vmatpush1.bf16.msra.mxu1 %v4787_v27  ;;  %1278 = vmatprep.subr.bf16.mxu0 %v4788_v28  ;;  %v4824_v58 = vld [vmem:[%s7156_s2 + $0x144] ss:$16 sps:$4 sm:$0xff]   ;;  %v4828_v60 = vld [vmem:[%s7156_s2 + $0x140] ss:$16 sps:$4 sm:$0xff]   ;;  %v4857_v28 = vld [vmem:[%s7156_s2 + $0xc8] ss:$16 sps:$4 sm:$0xff]  }
  0x1d   :  { %1321 = vmatprep.subr.bf16.mxu1 %v4790_v29  ;;  %1296 = vmatprep.mubr.bf16.mxu0 %v5764_v53  ;;  %v4826_v59 = vld [vmem:[%s7156_s2 + $0x344] ss:$16 sps:$4 sm:$0xff]   ;;  %v4829_v61 = vld [vmem:[%s7156_s2 + $0x340] ss:$16 sps:$4 sm:$0xff]   ;;  %v4889_v49 = vld [vmem:[%s7156_s2 + $0x2c] ss:$16 sps:$4 sm:$0xff]  }
  0x1e   :  { %1339 = vmatprep.mubr.bf16.mxu1 %v5766_v54  ;;  %v4830_v62 = vld [vmem:[%s7156_s2 + $0x124] ss:$16 sps:$4 sm:$0xff]   ;;  %v4834_v0 = vld [vmem:[%s7156_s2 + $0x120] ss:$16 sps:$4 sm:$0xff]  }
  0x1f   :  { %1279 = vmatpush1.bf16.msra.mxu0 %v4792_v30  ;;  %v4832_v63 = vld [vmem:[%s7156_s2 + $0x324] ss:$16 sps:$4 sm:$0xff]   ;;  %v4835_v1 = vld [vmem:[%s7156_s2 + $0x320] ss:$16 sps:$4 sm:$0xff]   ;;  %v4865_v30 = vld [vmem:[%s7156_s2 + $0xac] ss:$16 sps:$4 sm:$0xff]  }
  0x20   :  { %1322 = vmatpush1.bf16.msra.mxu1 %v4793_v31  ;;  %1280 = vmatprep.subr.bf16.mxu0 %v4794_v32  ;;  %v4836_v2 = vld [vmem:[%s7156_s2 + $0x104] ss:$16 sps:$4 sm:$0xff]   ;;  %v4840_v4 = vld [vmem:[%s7156_s2 + $0x100] ss:$16 sps:$4 sm:$0xff]   ;;  %v4863_v32 = vld [vmem:[%s7156_s2 + $0xa8] ss:$16 sps:$4 sm:$0xff]  }
  0x21   :  { %1323 = vmatprep.subr.bf16.mxu1 %v4796_v33  ;;  %v4838_v3 = vld [vmem:[%s7156_s2 + $0x304] ss:$16 sps:$4 sm:$0xff]   ;;  %v4841_v5 = vld [vmem:[%s7156_s2 + $0x300] ss:$16 sps:$4 sm:$0xff]  }
  0x22   :  { %v41_v6 = vld [vmem:[%s7154_s0] sm:$0xff]  ;;  %v43_v8 = vld [vmem:[%s7154_s0 + $0x10] sm:$0xff] }
  0x23   :  { %1281 = vmatpush2.bf16.msra.mxu0 %v4798_v34  ;;  %v4844_v10 = vld [vmem:[%s7156_s2 + $0x4e4] ss:$16 sps:$4 sm:$0xff]   ;;  %v5833_v12 = vpack.c.bf16 %v48_v7, %v41_v6  ;;  %v5835_v13 = vpack.c.bf16 %v50_v9, %v43_v8  ;;  %v4842_v14 = vld [vmem:[%s7156_s2 + $0x4e0] ss:$16 sps:$4 sm:$0xff]   ;;  %v4871_v34 = vld [vmem:[%s7156_s2 + $0x8c] ss:$16 sps:$4 sm:$0xff]  }
  0x24   :  { %1324 = vmatpush2.bf16.msra.mxu1 %v4799_v35  ;;  %1282 = vmatprep.subr.bf16.mxu0 %v4800_v36  ;;  %v4847_v11 = vld [vmem:[%s7156_s2 + $0x604] ss:$16 sps:$4 sm:$0xff]   ;;  %v4845_v15 = vld [vmem:[%s7156_s2 + $0x600] ss:$16 sps:$4 sm:$0xff]   ;;  %v4869_v36 = vld [vmem:[%s7156_s2 + $0x88] ss:$16 sps:$4 sm:$0xff]  }
  0x25   :  { %1325 = vmatprep.subr.bf16.mxu1 %v4802_v37  ;;  %v4850_v16 = vld [vmem:[%s7156_s2 + $0x4c4] ss:$16 sps:$4 sm:$0xff]   ;;  %v4848_v18 = vld [vmem:[%s7156_s2 + $0x4c0] ss:$16 sps:$4 sm:$0xff]   ;;  %v4919_v6 = vld [vmem:[%s7156_s2 + $0x18c] ss:$16 sps:$4 sm:$0xff]  }
  0x26   :  { %v47_v19 = vld [vmem:[%s7154_s0 + $0x30] sm:$0xff]  ;;  %v4917_v8 = vld [vmem:[%s7156_s2 + $0x188] ss:$16 sps:$4 sm:$0xff]  }
  0x27   :  { %1283 = vmatpush2.bf16.msra.mxu0 %v4804_v38  ;;  %v4856_v22 = vld [vmem:[%s7156_s2 + $0x4a4] ss:$16 sps:$4 sm:$0xff]   ;;  %v5864_v23 = vpack.c.bf16 %v54_v20, %v47_v19  ;;  %v4854_v25 = vld [vmem:[%s7156_s2 + $0x4a0] ss:$16 sps:$4 sm:$0xff]   ;;  %v4877_v38 = vld [vmem:[%s7156_s2 + $0x6c] ss:$16 sps:$4 sm:$0xff]  }
  0x28   :  { %1326 = vmatpush2.bf16.msra.mxu1 %v4805_v39  ;;  %1284 = vmatprep.subr.bf16.mxu0 %v4806_v40  ;;  %v4862_v27 = vld [vmem:[%s7156_s2 + $0x484] ss:$16 sps:$4 sm:$0xff]   ;;  %v4860_v29 = vld [vmem:[%s7156_s2 + $0x480] ss:$16 sps:$4 sm:$0xff]   ;;  %v4875_v40 = vld [vmem:[%s7156_s2 + $0x68] ss:$16 sps:$4 sm:$0xff]  }
  0x29   :  { %1327 = vmatprep.subr.bf16.mxu1 %v4808_v41  ;;  %v4868_v31 = vld [vmem:[%s7156_s2 + $0x464] ss:$16 sps:$4 sm:$0xff]   ;;  %v4866_v33 = vld [vmem:[%s7156_s2 + $0x460] ss:$16 sps:$4 sm:$0xff]   ;;  %v46_v41 = vld [vmem:[%s7154_s0 + $0x28] sm:$0xff] }
  0x2a   :  { %v4874_v35 = vld [vmem:[%s7156_s2 + $0x444] ss:$16 sps:$4 sm:$0xff]   ;;  %v4872_v37 = vld [vmem:[%s7156_s2 + $0x440] ss:$16 sps:$4 sm:$0xff]  }
  0x2b   :  { %1285 = vmatpush2.bf16.msra.mxu0 %v4810_v42  ;;  %v4880_v39 = vld [vmem:[%s7156_s2 + $0x424] ss:$16 sps:$4 sm:$0xff]   ;;  %v4884_v48 = vld [vmem:[%s7156_s2 + $0x400] ss:$16 sps:$4 sm:$0xff]  }
  0x2c   :  { %1328 = vmatpush2.bf16.msra.mxu1 %v4811_v43  ;;  %1286 = vmatprep.subr.bf16.mxu0 %v4812_v44  ;;  %v53_v42 = vld [vmem:[%s7154_s0 + $0x60] sm:$0xff] }
  0x2d   :  { %1329 = vmatprep.subr.bf16.mxu1 %v4814_v45  ;;  %v4878_v43 = vld [vmem:[%s7156_s2 + $0x420] ss:$16 sps:$4 sm:$0xff]   ;;  %v5929_v44 = vpack.c.bf16 %v53_v42, %v46_v41  ;;  %v4883_v45 = vld [vmem:[%s7156_s2 + $0x4c] ss:$16 sps:$4 sm:$0xff]   ;;  %v4886_v46 = vld [vmem:[%s7156_s2 + $0x404] ss:$16 sps:$4 sm:$0xff]  }
  0x2e   :  { %v4922_v7 = vld [vmem:[%s7156_s2 + $0x544] ss:$16 sps:$4 sm:$0xff]   ;;  %v4920_v9 = vld [vmem:[%s7156_s2 + $0x540] ss:$16 sps:$4 sm:$0xff]   ;;  %v4964_v41 = vld [vmem:[%s7156_s2 + $0x26c] ss:$16 sps:$4 sm:$0xff]  }
  0x2f   :  { %1287 = vmatpush2.bf16.msra.mxu0 %v4816_v50  ;;  %v4892_v50 = vld [vmem:[%s7156_s2 + $0x5e4] ss:$16 sps:$4 sm:$0xff]   ;;  %v4932_v19 = vld [vmem:[%s7156_s2 + $0x500] ss:$16 sps:$4 sm:$0xff]   ;;  %v4959_v42 = vld [vmem:[%s7156_s2 + $0x4a8] ss:$16 sps:$4 sm:$0xff]  }
  0x30   :  { %1330 = vmatpush2.bf16.msra.mxu1 %v4817_v51  ;;  %1288 = vmatprep.subr.bf16.mxu0 %v4818_v52  ;;  %v4887_v51 = vld [vmem:[%s7156_s2 + $0x28] ss:$16 sps:$4 sm:$0xff]   ;;  %v4890_v52 = vld [vmem:[%s7156_s2 + $0x5e0] ss:$16 sps:$4 sm:$0xff]  }
  0x31   :  { %1331 = vmatprep.subr.bf16.mxu1 %v4820_v55  ;;  %v4898_v55 = vld [vmem:[%s7156_s2 + $0x5c4] ss:$16 sps:$4 sm:$0xff]  }
  0x32   :  { %v45_v20 = vld [vmem:[%s7154_s0 + $0x20] sm:$0xff] }
  0x33   :  { %1289 = vmatpush2.bf16.msra.mxu0 %v4822_v56  ;;  %v4893_v56 = vld [vmem:[%s7156_s2 + $0x8] ss:$16 sps:$4 sm:$0xff]  }
  0x34   :  { %1332 = vmatpush2.bf16.msra.mxu1 %v4823_v57  ;;  %1290 = vmatprep.subr.bf16.mxu0 %v4824_v58  ;;  %v4896_v57 = vld [vmem:[%s7156_s2 + $0x5c0] ss:$16 sps:$4 sm:$0xff]   ;;  %v4901_v58 = vld [vmem:[%s7156_s2 + $0x1ec] ss:$16 sps:$4 sm:$0xff]  }
  0x35   :  { %1333 = vmatprep.subr.bf16.mxu1 %v4826_v59  ;;  %v4904_v59 = vld [vmem:[%s7156_s2 + $0x5a4] ss:$16 sps:$4 sm:$0xff]  }
  0x37   :  { %1291 = vmatpush2.bf16.msra.mxu0 %v4828_v60  ;;  %v4899_v60 = vld [vmem:[%s7156_s2 + $0x1e8] ss:$16 sps:$4 sm:$0xff]  }
  0x38   :  { %1334 = vmatpush2.bf16.msra.mxu1 %v4829_v61  ;;  %1292 = vmatprep.subr.bf16.mxu0 %v4830_v62  ;;  %v4902_v61 = vld [vmem:[%s7156_s2 + $0x5a0] ss:$16 sps:$4 sm:$0xff]   ;;  %v4907_v62 = vld [vmem:[%s7156_s2 + $0x1cc] ss:$16 sps:$4 sm:$0xff]  }
  0x39   :  { %1335 = vmatprep.subr.bf16.mxu1 %v4832_v63  ;;  %v4910_v63 = vld [vmem:[%s7156_s2 + $0x584] ss:$16 sps:$4 sm:$0xff]  }
  0x3b   :  { %1293 = vmatpush2.bf16.msra.mxu0 %v4834_v0  ;;  %v4905_v0 = vld [vmem:[%s7156_s2 + $0x1c8] ss:$16 sps:$4 sm:$0xff]  }
  0x3c   :  { %1336 = vmatpush2.bf16.msra.mxu1 %v4835_v1  ;;  %1294 = vmatprep.subr.bf16.mxu0 %v4836_v2  ;;  %v4908_v1 = vld [vmem:[%s7156_s2 + $0x580] ss:$16 sps:$4 sm:$0xff]   ;;  %v4913_v2 = vld [vmem:[%s7156_s2 + $0x1ac] ss:$16 sps:$4 sm:$0xff]  }
  0x3d   :  { %1337 = vmatprep.subr.bf16.mxu1 %v4838_v3  ;;  %v4916_v3 = vld [vmem:[%s7156_s2 + $0x564] ss:$16 sps:$4 sm:$0xff]  }
  0x3f   :  { %1295 = vmatpush2.bf16.msra.mxu0 %v4840_v4  ;;  %v4911_v4 = vld [vmem:[%s7156_s2 + $0x1a8] ss:$16 sps:$4 sm:$0xff]  }
  0x40   :  { %1338 = vmatpush2.bf16.msra.mxu1 %v4841_v5  ;;  %1350 = vmatprep.subr.bf16.mxu0 %v4844_v10  ;;  %v4914_v5 = vld [vmem:[%s7156_s2 + $0x560] ss:$16 sps:$4 sm:$0xff]   ;;  %v4925_v10 = vld [vmem:[%s7156_s2 + $0x16c] ss:$16 sps:$4 sm:$0xff]  }
  0x41   :  { %1407 = vmatprep.subr.bf16.mxu1 %v4847_v11  ;;  %v4928_v11 = vld [vmem:[%s7156_s2 + $0x524] ss:$16 sps:$4 sm:$0xff]  }
  0x42   :  { %1297 = vmatmul.mubr.bf16.vlgmr.msra.gmra.mxu0 %v5833_v12 }
  0x43   :  { %1340 = vmatmul.mubr.bf16.vlgmr.msra.gmra.mxu1 %v5835_v13  ;;  %1351 = vmatpush1.bf16.msra.mxu0 %v4842_v14  ;;  %v4923_v14 = vld [vmem:[%s7156_s2 + $0x168] ss:$16 sps:$4 sm:$0xff]  }
  0x44   :  { %1408 = vmatpush1.bf16.msra.mxu1 %v4845_v15  ;;  %1352 = vmatprep.subr.bf16.mxu0 %v4850_v16  ;;  %v4926_v15 = vld [vmem:[%s7156_s2 + $0x520] ss:$16 sps:$4 sm:$0xff]   ;;  %v4931_v16 = vld [vmem:[%s7156_s2 + $0x14c] ss:$16 sps:$4 sm:$0xff]  }
  0x45   :  { %1425 = vmatprep.mubr.bf16.mxu1 %v5532_v21  ;;  %1436 = vmatprep.subr.bf16.mxu1 %v4853_v17  ;;  %v4934_v17 = vld [vmem:[%s7156_s2 + $0x504] ss:$16 sps:$4 sm:$0xff]  }
  0x46   :  { %1382 = vmatprep.mubr.bf16.mxu0 %v5929_v44 }
  0x47   :  { %1353 = vmatpush1.bf16.msra.mxu0 %v4848_v18  ;;  %v4929_v18 = vld [vmem:[%s7156_s2 + $0x148] ss:$16 sps:$4 sm:$0xff]  }
  0x48   :  { %1354 = vmatprep.subr.bf16.mxu0 %v4856_v22  ;;  %v52_v22 = vld [vmem:[%s7154_s0 + $0x58] sm:$0xff] }
  0x4b   :  { %4341 = vmatmul.mubr.msk.bf16.vlgmr.msra.gmra.mxu1 %vm1260_vm0, %v5864_v23  ;;  %1355 = vmatpush1.bf16.msra.mxu0 %v4854_v25  ;;  %v4940_v25 = vld [vmem:[%s7156_s2 + $0x2ec] ss:$16 sps:$4 sm:$0xff]  }
  0x4c   :  { %1437 = vmatpush1.bf16.msra.mxu1 %v4851_v24  ;;  %1356 = vmatprep.subr.bf16.mxu0 %v4862_v27  ;;  %v4937_v24 = vld [vmem:[%s7156_s2 + $0x12c] ss:$16 sps:$4 sm:$0xff]   ;;  %v4935_v27 = vld [vmem:[%s7156_s2 + $0x128] ss:$16 sps:$4 sm:$0xff]  }
  0x4d   :  { %1438 = vmatprep.subr.bf16.mxu1 %v4859_v26  ;;  %1468 = vmatprep.mubr.bf16.mxu1 %v5764_v53  ;;  %v4895_v53 = vld [vmem:[%s7156_s2 + $0xc] ss:$16 sps:$4 sm:$0xff]   ;;  %v6052_v26 = vpack.c.bf16 %v52_v22, %v45_v20  ;;  %v5019_v20 = vld [vmem:[%s7156_s2 + $0x568] ss:$16 sps:$4 sm:$0xff]  }
  0x4e   :  { %v5022_v22 = vld [vmem:[%s7156_s2 + $0x328] ss:$16 sps:$4 sm:$0xff]  }
  0x4f   :  { %1357 = vmatpush1.bf16.msra.mxu0 %v4860_v29  ;;  %v4943_v29 = vld [vmem:[%s7156_s2 + $0x10c] ss:$16 sps:$4 sm:$0xff]  }
  0x50   :  { %1439 = vmatpush1.bf16.msra.mxu1 %v4857_v28  ;;  %1358 = vmatprep.subr.bf16.mxu0 %v4868_v31  ;;  %v4938_v28 = vld [vmem:[%s7156_s2 + $0x2e8] ss:$16 sps:$4 sm:$0xff]  }
  0x51   :  { %1440 = vmatprep.subr.bf16.mxu1 %v4865_v30  ;;  %v4946_v30 = vld [vmem:[%s7156_s2 + $0x2cc] ss:$16 sps:$4 sm:$0xff]   ;;  %v4941_v31 = vld [vmem:[%s7156_s2 + $0x108] ss:$16 sps:$4 sm:$0xff]  }
  0x53   :  { %1359 = vmatpush1.bf16.msra.mxu0 %v4866_v33  ;;  %v4949_v33 = vld [vmem:[%s7156_s2 + $0x4ec] ss:$16 sps:$4 sm:$0xff]  }
  0x54   :  { %1441 = vmatpush1.bf16.msra.mxu1 %v4863_v32  ;;  %1360 = vmatprep.subr.bf16.mxu0 %v4874_v35  ;;  %v4944_v32 = vld [vmem:[%s7156_s2 + $0x2c8] ss:$16 sps:$4 sm:$0xff]  }
  0x55   :  { %1442 = vmatprep.subr.bf16.mxu1 %v4871_v34  ;;  %v4952_v34 = vld [vmem:[%s7156_s2 + $0x2ac] ss:$16 sps:$4 sm:$0xff]   ;;  %v4947_v35 = vld [vmem:[%s7156_s2 + $0x4e8] ss:$16 sps:$4 sm:$0xff]  }
  0x57   :  { %1361 = vmatpush1.bf16.msra.mxu0 %v4872_v37  ;;  %v4955_v37 = vld [vmem:[%s7156_s2 + $0x4cc] ss:$16 sps:$4 sm:$0xff]  }
  0x58   :  { %1443 = vmatpush1.bf16.msra.mxu1 %v4869_v36  ;;  %1362 = vmatprep.subr.bf16.mxu0 %v4880_v39  ;;  %v4950_v36 = vld [vmem:[%s7156_s2 + $0x2a8] ss:$16 sps:$4 sm:$0xff]  }
  0x59   :  { %1444 = vmatprep.subr.bf16.mxu1 %v4877_v38  ;;  %v4958_v38 = vld [vmem:[%s7156_s2 + $0x28c] ss:$16 sps:$4 sm:$0xff]   ;;  %v4953_v39 = vld [vmem:[%s7156_s2 + $0x4c8] ss:$16 sps:$4 sm:$0xff]  }
  0x5b   :  { %1363 = vmatpush1.bf16.msra.mxu0 %v4878_v43  ;;  %v4967_v43 = vld [vmem:[%s7156_s2 + $0x48c] ss:$16 sps:$4 sm:$0xff]  }
  0x5c   :  { %1445 = vmatpush1.bf16.msra.mxu1 %v4875_v40  ;;  %1364 = vmatprep.subr.bf16.mxu0 %v4886_v46  ;;  %v4961_v40 = vld [vmem:[%s7156_s2 + $0x4ac] ss:$16 sps:$4 sm:$0xff]   ;;  %v4965_v46 = vld [vmem:[%s7156_s2 + $0x488] ss:$16 sps:$4 sm:$0xff]  }
  0x5d   :  { %1446 = vmatprep.subr.bf16.mxu1 %v4883_v45  ;;  %v4970_v45 = vld [vmem:[%s7156_s2 + $0x24c] ss:$16 sps:$4 sm:$0xff]  }
  0x5f   :  { %1365 = vmatpush1.bf16.msra.mxu0 %v4884_v48  ;;  %v4976_v48 = vld [vmem:[%s7156_s2 + $0x22c] ss:$16 sps:$4 sm:$0xff]  }
  0x60   :  { %1447 = vmatpush1.bf16.msra.mxu1 %v4881_v47  ;;  %1366 = vmatprep.subr.bf16.mxu0 %v4892_v50  ;;  %v4973_v47 = vld [vmem:[%s7156_s2 + $0x46c] ss:$16 sps:$4 sm:$0xff]   ;;  %v4974_v50 = vld [vmem:[%s7156_s2 + $0x228] ss:$16 sps:$4 sm:$0xff]  }
  0x61   :  { %1448 = vmatprep.subr.bf16.mxu1 %v4889_v49  ;;  %v4971_v49 = vld [vmem:[%s7156_s2 + $0x468] ss:$16 sps:$4 sm:$0xff]  }
  0x63   :  { %1367 = vmatpush2.bf16.msra.mxu0 %v4890_v52  ;;  %v4982_v52 = vld [vmem:[%s7156_s2 + $0x20c] ss:$16 sps:$4 sm:$0xff]  }
  0x64   :  { %1449 = vmatpush1.bf16.msra.mxu1 %v4887_v51  ;;  %1368 = vmatprep.subr.bf16.mxu0 %v4898_v55  ;;  %v4979_v51 = vld [vmem:[%s7156_s2 + $0x44c] ss:$16 sps:$4 sm:$0xff]   ;;  %v4980_v55 = vld [vmem:[%s7156_s2 + $0x208] ss:$16 sps:$4 sm:$0xff]  }
  0x65   :  { %1450 = vmatprep.subr.bf16.mxu1 %v4895_v53  ;;  %v4977_v53 = vld [vmem:[%s7156_s2 + $0x448] ss:$16 sps:$4 sm:$0xff]  }
  0x67   :  { %1369 = vmatpush2.bf16.msra.mxu0 %v4896_v57  ;;  %v4988_v57 = vld [vmem:[%s7156_s2 + $0x3ec] ss:$16 sps:$4 sm:$0xff]  }
  0x68   :  { %1451 = vmatpush1.bf16.msra.mxu1 %v4893_v56  ;;  %1370 = vmatprep.subr.bf16.mxu0 %v4904_v59  ;;  %v4985_v56 = vld [vmem:[%s7156_s2 + $0x42c] ss:$16 sps:$4 sm:$0xff]   ;;  %v4986_v59 = vld [vmem:[%s7156_s2 + $0x3e8] ss:$16 sps:$4 sm:$0xff]  }
  0x69   :  { %1452 = vmatprep.subr.bf16.mxu1 %v4901_v58  ;;  %v4983_v58 = vld [vmem:[%s7156_s2 + $0x428] ss:$16 sps:$4 sm:$0xff]  }
  0x6b   :  { %1371 = vmatpush2.bf16.msra.mxu0 %v4902_v61  ;;  %v4994_v61 = vld [vmem:[%s7156_s2 + $0x3cc] ss:$16 sps:$4 sm:$0xff]  }
  0x6c   :  { %1453 = vmatpush2.bf16.msra.mxu1 %v4899_v60  ;;  %1372 = vmatprep.subr.bf16.mxu0 %v4910_v63  ;;  %v4991_v60 = vld [vmem:[%s7156_s2 + $0x40c] ss:$16 sps:$4 sm:$0xff]   ;;  %v4992_v63 = vld [vmem:[%s7156_s2 + $0x3c8] ss:$16 sps:$4 sm:$0xff]  }
  0x6d   :  { %1454 = vmatprep.subr.bf16.mxu1 %v4907_v62  ;;  %v4989_v62 = vld [vmem:[%s7156_s2 + $0x408] ss:$16 sps:$4 sm:$0xff]  }
  0x6f   :  { %1373 = vmatpush2.bf16.msra.mxu0 %v4908_v1  ;;  %v5000_v1 = vld [vmem:[%s7156_s2 + $0x3ac] ss:$16 sps:$4 sm:$0xff]  }
  0x70   :  { %1455 = vmatpush2.bf16.msra.mxu1 %v4905_v0  ;;  %1374 = vmatprep.subr.bf16.mxu0 %v4916_v3  ;;  %v4997_v0 = vld [vmem:[%s7156_s2 + $0x5ec] ss:$16 sps:$4 sm:$0xff]   ;;  %v4998_v3 = vld [vmem:[%s7156_s2 + $0x3a8] ss:$16 sps:$4 sm:$0xff]  }
  0x71   :  { %1456 = vmatprep.subr.bf16.mxu1 %v4913_v2  ;;  %v4995_v2 = vld [vmem:[%s7156_s2 + $0x5e8] ss:$16 sps:$4 sm:$0xff]  }
  0x73   :  { %1375 = vmatpush2.bf16.msra.mxu0 %v4914_v5  ;;  %v5006_v5 = vld [vmem:[%s7156_s2 + $0x38c] ss:$16 sps:$4 sm:$0xff]  }
  0x74   :  { %1457 = vmatpush2.bf16.msra.mxu1 %v4911_v4  ;;  %1376 = vmatprep.subr.bf16.mxu0 %v4922_v7  ;;  %v5003_v4 = vld [vmem:[%s7156_s2 + $0x5cc] ss:$16 sps:$4 sm:$0xff]   ;;  %v5004_v7 = vld [vmem:[%s7156_s2 + $0x388] ss:$16 sps:$4 sm:$0xff]  }
  0x75   :  { %1458 = vmatprep.subr.bf16.mxu1 %v4919_v6  ;;  %v5001_v6 = vld [vmem:[%s7156_s2 + $0x5c8] ss:$16 sps:$4 sm:$0xff]  }
  0x77   :  { %1377 = vmatpush2.bf16.msra.mxu0 %v4920_v9  ;;  %v5012_v9 = vld [vmem:[%s7156_s2 + $0x36c] ss:$16 sps:$4 sm:$0xff]  }
  0x78   :  { %1459 = vmatpush2.bf16.msra.mxu1 %v4917_v8  ;;  %1378 = vmatprep.subr.bf16.mxu0 %v4928_v11  ;;  %v5009_v8 = vld [vmem:[%s7156_s2 + $0x5ac] ss:$16 sps:$4 sm:$0xff]   ;;  %v5010_v11 = vld [vmem:[%s7156_s2 + $0x368] ss:$16 sps:$4 sm:$0xff]  }
  0x79   :  { %1460 = vmatprep.subr.bf16.mxu1 %v4925_v10  ;;  %v5007_v10 = vld [vmem:[%s7156_s2 + $0x5a8] ss:$16 sps:$4 sm:$0xff]  }
  0x7b   :  { %1379 = vmatpush2.bf16.msra.mxu0 %v4926_v15  ;;  %v5018_v15 = vld [vmem:[%s7156_s2 + $0x34c] ss:$16 sps:$4 sm:$0xff]  }
  0x7c   :  { %1461 = vmatpush2.bf16.msra.mxu1 %v4923_v14  ;;  %1380 = vmatprep.subr.bf16.mxu0 %v4934_v17  ;;  %v5015_v14 = vld [vmem:[%s7156_s2 + $0x58c] ss:$16 sps:$4 sm:$0xff]   ;;  %v5016_v17 = vld [vmem:[%s7156_s2 + $0x348] ss:$16 sps:$4 sm:$0xff]  }
  0x7d   :  { %1462 = vmatprep.subr.bf16.mxu1 %v4931_v16  ;;  %v5013_v16 = vld [vmem:[%s7156_s2 + $0x588] ss:$16 sps:$4 sm:$0xff]  }
  0x7f   :  { %1381 = vmatpush2.bf16.msra.mxu0 %v4932_v19  ;;  %v5024_v19 = vld [vmem:[%s7156_s2 + $0x32c] ss:$16 sps:$4 sm:$0xff]  }
  0x80   :  { %1463 = vmatpush2.bf16.msra.mxu1 %v4929_v18  ;;  %1479 = vmatprep.subr.bf16.mxu0 %v4940_v25  ;;  %v5021_v18 = vld [vmem:[%s7156_s2 + $0x56c] ss:$16 sps:$4 sm:$0xff]  }
  0x81   :  { %1464 = vmatprep.subr.bf16.mxu1 %v4937_v24  ;;  %v5027_v24 = vld [vmem:[%s7156_s2 + $0x54c] ss:$16 sps:$4 sm:$0xff]  }
  0x82   :  { %1383 = vmatmul.mubr.bf16.vlgmr.msra.gmra.mxu0 %v6052_v26  ;;  %v5030_v25 = vld [vmem:[%s7156_s2 + $0x30c] ss:$16 sps:$4 sm:$0xff]  }
  0x83   :  { %1480 = vmatpush1.bf16.msra.mxu0 %v4938_v28  ;;  %1511 = vmatprep.mubr.bf16.mxu0 %v5766_v54  ;;  %v4956_v54 = vld [vmem:[%s7156_s2 + $0x288] ss:$16 sps:$4 sm:$0xff]  }
  0x84   :  { %1465 = vmatpush2.bf16.msra.mxu1 %v4935_v27  ;;  %1481 = vmatprep.subr.bf16.mxu0 %v4946_v30  ;;  %v5025_v27 = vld [vmem:[%s7156_s2 + $0x548] ss:$16 sps:$4 sm:$0xff]   ;;  %v5036_v30 = vld [vmem:[%s7156_s2 + $0x60c] ss:$16 sps:$4 sm:$0xff]  }
  0x85   :  { %1466 = vmatprep.subr.bf16.mxu1 %v4943_v29  ;;  %v5028_v28 = vld [vmem:[%s7156_s2 + $0x308] ss:$16 sps:$4 sm:$0xff]   ;;  %v5033_v29 = vld [vmem:[%s7156_s2 + $0x52c] ss:$16 sps:$4 sm:$0xff]  }
  0x87   :  { %1482 = vmatpush1.bf16.msra.mxu0 %v4944_v32  ;;  %v5034_v32 = vld [vmem:[%s7156_s2 + $0x608] ss:$16 sps:$4 sm:$0xff]  }
  0x88   :  { %1467 = vmatpush2.bf16.msra.mxu1 %v4941_v31  ;;  %1483 = vmatprep.subr.bf16.mxu0 %v4952_v34  ;;  %v5031_v31 = vld [vmem:[%s7156_s2 + $0x528] ss:$16 sps:$4 sm:$0xff]  }
  0x89   :  { %1522 = vmatprep.subr.bf16.mxu1 %v4949_v33  ;;  %v5039_v33 = vld [vmem:[%s7156_s2 + $0x50c] ss:$16 sps:$4 sm:$0xff]  }
  0x8a   :  { %v5040_v34 = vld [vmem:[%s7158_s4 + $0x78] sm:$0xff]  }
  0x8b   :  { %1469 = vmatmul.mubr.bf16.vlgmr.msra.gmra.mxu1 %v5833_v12  ;;  %1484 = vmatpush1.bf16.msra.mxu0 %v4950_v36  ;;  %v4962_v12 = vld [vmem:[%s7156_s2 + $0x268] ss:$16 sps:$4 sm:$0xff]  }
  0x8c   :  { %1523 = vmatpush1.bf16.msra.mxu1 %v4947_v35  ;;  %1485 = vmatprep.subr.bf16.mxu0 %v4958_v38  ;;  %v5037_v35 = vld [vmem:[%s7156_s2 + $0x508] ss:$16 sps:$4 sm:$0xff]  }
  0x8d   :  { %1524 = vmatprep.subr.bf16.mxu1 %v4955_v37  ;;  %1554 = vmatprep.mubr.bf16.mxu1 %v5929_v44  ;;  %v4968_v44 = vld [vmem:[%s7156_s2 + $0x248] ss:$16 sps:$4 sm:$0xff]   ;;  %v5042_v37 = vld [vmem:[%s7158_s4 + $0x70] sm:$0xff]  }
  0x8e   :  { %v5041_v36 = vld [vmem:[%s7158_s4 + $0x38] sm:$0xff]   ;;  %v5044_v38 = vld [vmem:[%s7158_s4 + $0x68] sm:$0xff]  }
  0x8f   :  { %1486 = vmatpush1.bf16.msra.mxu0 %v4956_v54  ;;  %v5046_v54 = vld [vmem:[%s7158_s4 + $0x60] sm:$0xff]  }
  0x90   :  { %1525 = vmatpush1.bf16.msra.mxu1 %v4953_v39  ;;  %1487 = vmatprep.subr.bf16.mxu0 %v4964_v41  ;;  %v5045_v39 = vld [vmem:[%s7158_s4 + $0x28] sm:$0xff]   ;;  %v5058_v41 = vld [vmem:[%s7158_s4 + $0xf0] sm:$0xff]  }
  0x91   :  { %1526 = vmatprep.subr.bf16.mxu1 %v4961_v40  ;;  %v5057_v40 = vld [vmem:[%s7158_s4 + $0xb8] sm:$0xff]  }
  0x93   :  { %1488 = vmatpush1.bf16.msra.mxu0 %v4962_v12  ;;  %v5059_v12 = vld [vmem:[%s7158_s4 + $0xb0] sm:$0xff]  }
  0x94   :  { %1527 = vmatpush1.bf16.msra.mxu1 %v4959_v42  ;;  %1489 = vmatprep.subr.bf16.mxu0 %v4970_v45  ;;  %v5048_v42 = vld [vmem:[%s7158_s4 + $0x58] sm:$0xff]  }
  0x95   :  { %1528 = vmatprep.subr.bf16.mxu1 %v4967_v43  ;;  %v5060_v43 = vld [vmem:[%s7158_s4 + $0xe8] sm:$0xff]   ;;  %v5049_v45 = vld [vmem:[%s7158_s4 + $0x18] sm:$0xff]  }
  0x97   :  { %1490 = vmatpush1.bf16.msra.mxu0 %v4968_v44  ;;  %v5051_v44 = vld [vmem:[%s7158_s4 + $0x10] sm:$0xff]  }
  0x98   :  { %1529 = vmatpush1.bf16.msra.mxu1 %v4965_v46  ;;  %1491 = vmatprep.subr.bf16.mxu0 %v4976_v48  ;;  %v5050_v46 = vld [vmem:[%s7158_s4 + $0x50] sm:$0xff]   ;;  %v5053_v48 = vld [vmem:[%s7158_s4 + $0x8] sm:$0xff]  }
  0x99   :  { %1530 = vmatprep.subr.bf16.mxu1 %v4973_v47  ;;  %v5052_v47 = vld [vmem:[%s7158_s4 + $0x48] sm:$0xff]  }
  0x9b   :  { %1492 = vmatpush1.bf16.msra.mxu0 %v4974_v50  ;;  %v5055_v50 = vld [vmem:[%s7158_s4] sm:$0xff]  }
  0x9c   :  { %1531 = vmatpush1.bf16.msra.mxu1 %v4971_v49  ;;  %1493 = vmatprep.subr.bf16.mxu0 %v4982_v52  ;;  %v5054_v49 = vld [vmem:[%s7158_s4 + $0x40] sm:$0xff]  }
  0x9d   :  { %1532 = vmatprep.subr.bf16.mxu1 %v4979_v51 }
  0x9f   :  { %1494 = vmatpush1.bf16.msra.mxu0 %v4980_v55 }
  0xa0   :  { %1533 = vmatpush1.bf16.msra.mxu1 %v4977_v53  ;;  %1495 = vmatprep.subr.bf16.mxu0 %v4988_v57 }
  0xa1   :  { %1534 = vmatprep.subr.bf16.mxu1 %v4985_v56 }
  0xa3   :  { %1496 = vmatpush2.bf16.msra.mxu0 %v4986_v59 }
  0xa4   :  { %1535 = vmatpush1.bf16.msra.mxu1 %v4983_v58  ;;  %1497 = vmatprep.subr.bf16.mxu0 %v4994_v61 }
  0xa5   :  { %1536 = vmatprep.subr.bf16.mxu1 %v4991_v60 }
  0xa7   :  { %1498 = vmatpush2.bf16.msra.mxu0 %v4992_v63 }
  0xa8   :  { %1537 = vmatpush1.bf16.msra.mxu1 %v4989_v62  ;;  %1499 = vmatprep.subr.bf16.mxu0 %v5000_v1 }
  0xa9   :  { %1538 = vmatprep.subr.bf16.mxu1 %v4997_v0 }
  0xab   :  { %1500 = vmatpush2.bf16.msra.mxu0 %v4998_v3 }
  0xac   :  { %1539 = vmatpush2.bf16.msra.mxu1 %v4995_v2  ;;  %1501 = vmatprep.subr.bf16.mxu0 %v5006_v5 }
  0xad   :  { %1540 = vmatprep.subr.bf16.mxu1 %v5003_v4 }
  0xaf   :  { %1502 = vmatpush2.bf16.msra.mxu0 %v5004_v7 }
  0xb0   :  { %1541 = vmatpush2.bf16.msra.mxu1 %v5001_v6  ;;  %1503 = vmatprep.subr.bf16.mxu0 %v5012_v9 }
  0xb1   :  { %1542 = vmatprep.subr.bf16.mxu1 %v5009_v8 }
  0xb3   :  { %1504 = vmatpush2.bf16.msra.mxu0 %v5010_v11 }
  0xb4   :  { %1543 = vmatpush2.bf16.msra.mxu1 %v5007_v10  ;;  %1505 = vmatprep.subr.bf16.mxu0 %v5018_v15 }
  0xb5   :  { %1544 = vmatprep.subr.bf16.mxu1 %v5015_v14 }
  0xb7   :  { %1506 = vmatpush2.bf16.msra.mxu0 %v5016_v17 }
  0xb8   :  { %1545 = vmatpush2.bf16.msra.mxu1 %v5013_v16  ;;  %1507 = vmatprep.subr.bf16.mxu0 %v5024_v19 }
  0xb9   :  { %1546 = vmatprep.subr.bf16.mxu1 %v5021_v18 }
  0xbb   :  { %1508 = vmatpush2.bf16.msra.mxu0 %v5022_v22 }
  0xbc   :  { %1547 = vmatpush2.bf16.msra.mxu1 %v5019_v20  ;;  %1509 = vmatprep.subr.bf16.mxu0 %v5030_v25 }
  0xbd   :  { %1548 = vmatprep.subr.bf16.mxu1 %v5027_v24 }
  0xbf   :  { %1510 = vmatpush2.bf16.msra.mxu0 %v5028_v28 }
  0xc0   :  { %1549 = vmatpush2.bf16.msra.mxu1 %v5025_v27  ;;  %1579 = vmatprep.subr.bf16.mxu0 %v5036_v30 }
  0xc1   :  { %1550 = vmatprep.subr.bf16.mxu1 %v5033_v29 }
  0xc2   :  { %1512 = vmatmul.mubr.bf16.vlgmr.msra.gmra.mxu0 %v5835_v13  ;;  %v5043_v13 = vld [vmem:[%s7158_s4 + $0x30] sm:$0xff]  }
  0xc3   :  { %1580 = vmatpush1.bf16.msra.mxu0 %v5034_v32  ;;  %1597 = vmatprep.mubr.bf16.mxu0 %v5532_v21 }
  0xc4   :  { %1551 = vmatpush2.bf16.msra.mxu1 %v5031_v31  ;;  %4650 = vmatprep.subr.bf16.mxu0 %v5040_v34 }
  0xc5   :  { %1552 = vmatprep.subr.bf16.mxu1 %v5039_v33 }
  0xc8   :  { %1553 = vmatpush2.bf16.msra.mxu1 %v5037_v35 }
  0xca   :  { %4342 = vmatmul.mubr.msk.bf16.vlgmr.msra.gmra.mxu0 %vm1260_vm0, %v5864_v23  ;;  %v5047_v23 = vld [vmem:[%s7158_s4 + $0x20] sm:$0xff]  }
  0xcb   :  { %1555 = vmatmul.mubr.bf16.vlgmr.msra.gmra.mxu1 %v6052_v26  ;;  %4651 = vmatpush3.bf16.msra.mxu0 %v5041_v36  ;;  %v5056_v26 = vld [vmem:[%s7158_s4 + $0xf8] sm:$0xff]  }
  0xcc   :  { %4652 = vmatprep.subr.bf16.mxu0 %v5042_v37  ;;  %4672 = vmatprep.subr.bf16.mxu1 %v5056_v26 }
  0xcd   :  { %4673 = vmatpush3.bf16.msra.mxu1 %v5057_v40 }
  0xce   :  { %4674 = vmatprep.subr.bf16.mxu1 %v5058_v41 }
  0xcf   :  { %4653 = vmatpush3.bf16.msra.mxu0 %v5043_v13 }
  0xd0   :  { %4654 = vmatprep.subr.bf16.mxu0 %v5044_v38 }
  0xd1   :  { %4675 = vmatpush3.bf16.msra.mxu1 %v5059_v12 }
  0xd2   :  { %4676 = vmatprep.subr.bf16.mxu1 %v5060_v43 }
  0xd3   :  { %4655 = vmatpush3.bf16.msra.mxu0 %v5045_v39 }
  0xd4   :  { %4656 = vmatprep.subr.bf16.mxu0 %v5046_v54 }
  0xd7   :  { %4657 = vmatpush3.bf16.msra.mxu0 %v5047_v23 }
  0xd8   :  { %4658 = vmatprep.subr.bf16.mxu0 %v5048_v42 }
  0xdb   :  { %4659 = vmatpush3.bf16.msra.mxu0 %v5049_v45 }
  0xdc   :  { %4660 = vmatprep.subr.bf16.mxu0 %v5050_v46 }
  0xdf   :  { %4661 = vmatpush3.bf16.msra.mxu0 %v5051_v44 }
  0xe0   :  { %4662 = vmatprep.subr.bf16.mxu0 %v5052_v47 }
  0xe3   :  { %4663 = vmatpush3.bf16.msra.mxu0 %v5053_v48 }
  0xe4   :  { %4664 = vmatprep.subr.bf16.mxu0 %v5054_v49 }
  0xe7   :  { %4665 = vmatpush3.bf16.msra.mxu0 %v5055_v50 }
  0xe8   :  { %19 = vsyncpa [#allocation5], 0  ;;  %v5061_v51 = vld [vmem:[%s7158_s4 + $0xa8] sm:$0xff]   ;;  %v5062_v52 = vld [vmem:[%s7158_s4 + $0xe0] sm:$0xff]   ;;  %v260_v0 = vlaneseq  ;;  %vm1973_vm1 = vcmask 257024   ;;  %vm2074_vm2 = vcmask 261120  }
  0xe9   :  { %4677 = vmatpush3.bf16.msra.mxu1 %v5061_v51  ;;  %v5063_v53 = vld [vmem:[%s7158_s4 + $0xa0] sm:$0xff]   ;;  %v5064_v55 = vld [vmem:[%s7158_s4 + $0xd8] sm:$0xff]   ;;  %v5066_v57 = vld [vmem:[%s7158_s4 + $0xd0] sm:$0xff]  }
  0xea   :  { %4678 = vmatprep.subr.bf16.mxu1 %v5062_v52  ;;  %v5065_v56 = vld [vmem:[%s7158_s4 + $0x98] sm:$0xff]   ;;  %v5067_v58 = vld [vmem:[%s7158_s4 + $0x90] sm:$0xff]   ;;  %v5068_v59 = vld [vmem:[%s7158_s4 + $0xc8] sm:$0xff]   ;;  %v6363_v2 = vshrl.u32 %v260_v0, 7 }
  0xeb   :  { %v5069_v60 = vld [vmem:[%s7158_s4 + $0x88] sm:$0xff]   ;;  %v5070_v61 = vld [vmem:[%s7158_s4 + $0xc0] sm:$0xff]  }
  0xec   :  { %v5071_v62 = vld [vmem:[%s7158_s4 + $0x80] sm:$0xff]   ;;  %v6366_v5 = vsub.s32 1, %v6363_v2  ;;  %v6369_v6 = vsub.s32 0, %v6363_v2  ;;  %v6378_v44 = vsub.s32 3, %v6363_v2  ;;  %v6381_v47 = vsub.s32 2, %v6363_v2 }
  0xed   :  { %4679 = vmatpush3.bf16.msra.mxu1 %v5063_v53  ;;  %v258_v8 = vld [vmem:[%s7157_s3] sm:$0xf] }
  0xee   :  { %4680 = vmatprep.subr.bf16.mxu1 %v5064_v55  ;;  %v267_v10 = vrot.slane %v258_v8, %v6366_v5  ;;  %v263_v11 = vrot.slane %v258_v8, %v6369_v6  ;;  %v275_v51 = vrot.slane %v258_v8, %v6378_v44  ;;  %v271_v52 = vrot.slane %v258_v8, %v6381_v47 }
  0xf1   :  { %4681 = vmatpush3.bf16.msra.mxu1 %v5065_v56 }
  0xf2   :  { %4682 = vmatprep.subr.bf16.mxu1 %v5066_v57 }
  0xf5   :  { %4683 = vmatpush3.bf16.msra.mxu1 %v5067_v58 }
  0xf6   :  { %4684 = vmatprep.subr.bf16.mxu1 %v5068_v59 }
  0xf9   :  { %4685 = vmatpush3.bf16.msra.mxu1 %v5069_v60 }
  0xfa   :  { %4686 = vmatprep.subr.bf16.mxu1 %v5070_v61 }
  0xfd   :  { %4687 = vmatpush3.bf16.msra.mxu1 %v5071_v62 }
 0x102   :  { %v1298_v3 = vpop.f32.mrf.mxu0 }
 0x103   :  { %v1341_v63 = vpop.f32.mrf.mxu1  ;;  %v1299_v17 = vadd.f32 %v1298_v3, %v263_v11 }
 0x104   :  { %v1300_v7 = vpop.f32.mrf.mxu0 }
 0x105   :  { %v1343_v1 = vpop.f32.mrf.mxu1  ;;  %v1301_v16 = vadd.f32 %v1300_v7, %v267_v10  ;;  %v1342_v27 = vadd.f32 %v1341_v63, %v1299_v17 }
 0x106   :  { %v1302_v14 = vpop.f32.mrf.mxu0 }
 0x107   :  { %v1345_v4 = vpop.f32.mrf.mxu1  ;;  %v1303_v19 = vadd.f32 %v1302_v14, %v263_v11  ;;  %v1344_v24 = vadd.f32 %v1343_v1, %v1301_v16 }
 0x108   :  { %v1304_v18 = vpop.f32.mrf.mxu0 }
 0x109   :  { %v1347_v9 = vpop.f32.mrf.mxu1  ;;  %v1305_v25 = vadd.f32 %v1304_v18, %v267_v10  ;;  %v1346_v29 = vadd.f32 %v1345_v4, %v1303_v19 }
 0x10b   :  { %v1427_v15 = vpop.f32.mrf.mxu1  ;;  %v1348_v34 = vadd.f32 %v1347_v9, %v1305_v25 }
 0x10d   :  { %v1429_v20 = vpop.f32.mrf.mxu1 }
 0x10f   :  { %v1431_v31 = vpop.f32.mrf.mxu1 }
 0x111   :  { %v1433_v39 = vpop.f32.mrf.mxu1 }
 0x142   :  { %v1384_v22 = vpop.f32.mrf.mxu0 }
 0x143   :  { %v1385_v32 = vadd.f32 %v1384_v22, %v1342_v27 }
 0x144   :  { %v1386_v28 = vpop.f32.mrf.mxu0 }
 0x145   :  { %v1387_v30 = vadd.f32 %v1386_v28, %v1344_v24  ;;  %v1428_v54 = vadd.f32 %v1427_v15, %v1385_v32  ;;  %v5074_v32 = vld [vmem:[%s7160_s6 + $0x24] ss:$16 sps:$4 sm:$0xff]  }
 0x146   :  { %v1388_v33 = vpop.f32.mrf.mxu0  ;;  %2090 = vmatprep.subr.bf16.mxu0 %v5074_v32  ;;  %v5110_v32 = vld [vmem:[%s7162_s8 + $0xac] ss:$28 sps:$4 sm:$0xff]  }
 0x147   :  { %v1389_v35 = vadd.f32 %v1388_v33, %v1346_v29  ;;  %v1430_v37 = vadd.f32 %v1429_v20, %v1387_v30  ;;  %v1608_v42 = vmax.f32 %v1428_v54, 0.0  ;;  %v5075_v33 = vld [vmem:[%s7160_s6 + $0x28] ss:$16 sps:$4 sm:$0xff]  }
 0x148   :  { %v1390_v36 = vpop.f32.mrf.mxu0 }
 0x149   :  { %v1432_v13 = vadd.f32 %v1431_v31, %v1389_v35  ;;  %v1391_v38 = vadd.f32 %v1390_v36, %v1348_v34  ;;  %v1609_v40 = vmax.f32 %v1430_v37, 0.0  ;;  %v5072_v31 = vld [vmem:[%s7160_s6 + $0x20] ss:$16 sps:$4 sm:$0xff]   ;;  %v5077_v34 = vld [vmem:[%s7160_s6 + $0x2c] ss:$16 sps:$4 sm:$0xff]  }
 0x14a   :  { %v5083_v35 = vld [vmem:[%s7160_s6 + $0xc] ss:$16 sps:$4 sm:$0xff]   ;;  %2133 = vmatprep.subr.bf16.mxu1 %v5077_v34  ;;  %v5078_v36 = vld [vmem:[%s7160_s6] ss:$16 sps:$4 sm:$0xff]   ;;  %v5081_v37 = vld [vmem:[%s7160_s6 + $0x8] ss:$16 sps:$4 sm:$0xff]  }
 0x14b   :  { %v1434_v23 = vadd.f32 %v1433_v39, %v1391_v38  ;;  %v1612_v26 = vmax.f32 %v1432_v13, 0.0  ;;  %v1470_v45 = vpop.f32.mrf.mxu1  ;;  %v5086_v13 = vld [vmem:[%s7162_s8 + $0x18c] ss:$28 sps:$4 sm:$0xff]  }
 0x14c   :  { %v1471_v58 = vadd.f32 %v1470_v45, %v271_v52  ;;  %v5089_v38 = vld [vmem:[%s7162_s8 + $0x50c] ss:$28 sps:$4 sm:$0xff]  }
 0x14d   :  { %v1613_v41 = vmax.f32 %v1434_v23, 0.0  ;;  %v1616_v43 = vpack.c.bf16 %v1612_v26, %v1608_v42  ;;  %v1472_v46 = vpop.f32.mrf.mxu1  ;;  %v5108_v34 = vld [vmem:[%s7162_s8 + $0xa8] ss:$28 sps:$4 sm:$0xff]  }
 0x14e   :  { %v1473_v57 = vadd.f32 %v1472_v46, %v275_v51 }
 0x14f   :  { %v1617_v12 = vpack.c.bf16 %v1613_v41, %v1609_v40  ;;  %v1474_v49 = vpop.f32.mrf.mxu1  ;;  %v4343_v40 = vld [vmem:[%s7159_s5] ss:$0 sm:$0xff] }
 0x150   :  { %v1475_v61 = vadd.f32 %v1474_v49, %v271_v52 }
 0x151   :  { %1915 = vmatprep.mubr.bf16.mxu0 %v1617_v12  ;;  %v1476_v55 = vpop.f32.mrf.mxu1 }
 0x152   :  { %1916 = vmatmul.mubr.bf16.vlgmr.msra.gmra.mxu0 %v1616_v43  ;;  %v1477_v3 = vadd.f32 %v1476_v55, %v275_v51 }
 0x153   :  { %2110 = vmatprep.mubr.bf16.mxu0 %v5532_v21  ;;  %2091 = vmatpush1.bf16.msra.mxu0 %v5072_v31  ;;  %v5105_v31 = vld [vmem:[%s7162_s8 + $0x460] ss:$28 sps:$4 sm:$0xff]  }
 0x182   :  { %v1513_v48 = vpop.f32.mrf.mxu0 }
 0x183   :  { %v1514_v63 = vadd.f32 %v1513_v48, %v1471_v58  ;;  %v1976_v48 = vld [vmem:[%s7155_s1] sm:$0xff] }
 0x184   :  { %v1515_v50 = vpop.f32.mrf.mxu0 }
 0x185   :  { %v1516_v62 = vadd.f32 %v1515_v50, %v1473_v57  ;;  %v1977_v57 = vld [vmem:[%s7155_s1 + $0x8] sm:$0xff] }
 0x186   :  { %v1517_v53 = vpop.f32.mrf.mxu0 }
 0x187   :  { %v1518_v4 = vadd.f32 %v1517_v53, %v1475_v61 }
 0x188   :  { %v1519_v56 = vpop.f32.mrf.mxu0 }
 0x189   :  { %v1520_v14 = vadd.f32 %v1519_v56, %v1477_v3 }
 0x18a   :  { %v1599_v60 = vpop.f32.mrf.mxu0 }
 0x18b   :  { %v1556_v59 = vpop.f32.mrf.mxu1 }
 0x18c   :  { %v1601_v1 = vpop.f32.mrf.mxu0  ;;  %v1557_v9 = vadd.f32 %v1556_v59, %v1514_v63 }
 0x18d   :  { %v1558_v0 = vpop.f32.mrf.mxu1 }
 0x18e   :  { %v1559_v7 = vadd.f32 %v1558_v0, %v1516_v62  ;;  %v1603_v11 = vpop.f32.mrf.mxu0  ;;  %v1600_v20 = vadd.f32 %v1599_v60, %v1557_v9 }
 0x18f   :  { %v1560_v10 = vpop.f32.mrf.mxu1 }
 0x190   :  { %v1561_v8 = vadd.f32 %v1560_v10, %v1518_v4  ;;  %v1605_v16 = vpop.f32.mrf.mxu0  ;;  %v1602_v17 = vadd.f32 %v1601_v1, %v1559_v7  ;;  %v1610_v28 = vmax.f32 %v1600_v20, 0.0  ;;  %v5093_v20 = vld [vmem:[%s7162_s8 + $0x4d0] ss:$28 sps:$4 sm:$0xff]  }
 0x191   :  { %v1562_v15 = vpop.f32.mrf.mxu1 }
 0x192   :  { %v1604_v18 = vadd.f32 %v1603_v11, %v1561_v8  ;;  %v1563_v19 = vadd.f32 %v1562_v15, %v1520_v14  ;;  %v1611_v25 = vmax.f32 %v1602_v17, 0.0  ;;  %v5084_v14 = vld [vmem:[%s7162_s8 + $0x188] ss:$28 sps:$4 sm:$0xff]   ;;  %v5095_v17 = vld [vmem:[%s7162_s8 + $0x4d4] ss:$28 sps:$4 sm:$0xff]  }
 0x193   :  { %v5087_v8 = vld [vmem:[%s7162_s8 + $0x508] ss:$28 sps:$4 sm:$0xff]  }
 0x194   :  { %v1606_v22 = vadd.f32 %v1605_v16, %v1563_v19  ;;  %v1614_v24 = vmax.f32 %v1604_v18, 0.0  ;;  %v5092_v16 = vld [vmem:[%s7162_s8 + $0x154] ss:$28 sps:$4 sm:$0xff]  }
 0x195   :  { %v5090_v19 = vld [vmem:[%s7162_s8 + $0x150] ss:$28 sps:$4 sm:$0xff]  }
 0x196   :  { %v1615_v27 = vmax.f32 %v1606_v22, 0.0  ;;  %v1618_v30 = vpack.c.bf16 %v1614_v24, %v1610_v28  ;;  %v5098_v22 = vld [vmem:[%s7162_s8 + $0x11c] ss:$28 sps:$4 sm:$0xff]   ;;  %v5104_v28 = vld [vmem:[%s7162_s8 + $0xe4] ss:$28 sps:$4 sm:$0xff]  }
 0x197   :  { %v5101_v24 = vld [vmem:[%s7162_s8 + $0x49c] ss:$28 sps:$4 sm:$0xff]  }
 0x198   :  { %v1619_v29 = vpack.c.bf16 %v1615_v27, %v1611_v25  ;;  %v5096_v25 = vld [vmem:[%s7162_s8 + $0x118] ss:$28 sps:$4 sm:$0xff]  }
 0x199   :  { %v5099_v27 = vld [vmem:[%s7162_s8 + $0x498] ss:$28 sps:$4 sm:$0xff]  }
 0x19a   :  { %1956 = vmatprep.mubr.bf16.mxu1 %v1619_v29  ;;  %v5107_v29 = vld [vmem:[%s7162_s8 + $0x464] ss:$28 sps:$4 sm:$0xff]  }
 0x19b   :  { %1957 = vmatmul.mubr.bf16.vlgmr.msra.gmra.mxu1 %v1618_v30  ;;  %v5102_v30 = vld [vmem:[%s7162_s8 + $0xe0] ss:$28 sps:$4 sm:$0xff]  }
 0x19c   :  { %2153 = vmatprep.mubr.bf16.mxu1 %v5532_v21  ;;  %v5080_v21 = vld [vmem:[%s7160_s6 + $0x4] ss:$16 sps:$4 sm:$0xff]   ;;  %2134 = vmatpush1.bf16.msra.mxu1 %v5075_v33  ;;  %v5113_v33 = vld [vmem:[%s7162_s8 + $0x42c] ss:$28 sps:$4 sm:$0xff]  }
 0x19d   :  { %2092 = vmatprep.subr.bf16.mxu0 %v5080_v21  ;;  %2135 = vmatprep.subr.bf16.mxu1 %v5083_v35  ;;  %v5111_v21 = vld [vmem:[%s7162_s8 + $0x428] ss:$28 sps:$4 sm:$0xff]   ;;  %v5116_v35 = vld [vmem:[%s7162_s8 + $0x74] ss:$28 sps:$4 sm:$0xff]  }
 0x19e   :  { %2093 = vmatpush1.bf16.msra.mxu0 %v5078_v36  ;;  %v5119_v36 = vld [vmem:[%s7162_s8 + $0x3f4] ss:$28 sps:$4 sm:$0xff]  }
 0x19f   :  { %3621 = vmatprep.subr.bf16.mxu0 %v5086_v13  ;;  %v5117_v13 = vld [vmem:[%s7162_s8 + $0x3f0] ss:$28 sps:$4 sm:$0xff]  }
 0x1a0   :  { %2136 = vmatpush1.bf16.msra.mxu1 %v5081_v37  ;;  %v5114_v37 = vld [vmem:[%s7162_s8 + $0x70] ss:$28 sps:$4 sm:$0xff]  }
 0x1a1   :  { %3664 = vmatprep.subr.bf16.mxu1 %v5089_v38  ;;  %v5122_v38 = vld [vmem:[%s7162_s8 + $0x3c] ss:$28 sps:$4 sm:$0xff]  }
 0x212   :  { %v4666_v39 = vpop.f32.mrf.mxu0 }
 0x214   :  { %v4667_v54 = vpop.f32.mrf.mxu0 }
 0x215   :  { %v4668_v26 = vadd.f32 %v4667_v54, %v4666_v39  ;;  %v5125_v39 = vld [vmem:[%s7162_s8 + $0x3bc] ss:$28 sps:$4 sm:$0xff]  }
 0x216   :  { %v4669_v23 = vpop.f32.mrf.mxu0  ;;  %v5120_v54 = vld [vmem:[%s7162_s8 + $0x38] ss:$28 sps:$4 sm:$0xff]  }
 0x217   :  { %v1918_v43 = vadd.f32 %v4668_v26, %v4343_v40  ;;  %v5128_v26 = vld [vmem:[%s7162_s8 + $0x4] ss:$28 sps:$4 sm:$0xff]  }
 0x218   :  { %v4670_v41 = vpop.f32.mrf.mxu0 }
 0x219   :  { %v4671_v45 = vadd.f32 %v4670_v41, %v4669_v23  ;;  %v5123_v23 = vld [vmem:[%s7162_s8 + $0x3b8] ss:$28 sps:$4 sm:$0xff]   ;;  %v5126_v41 = vld [vmem:[%s7162_s8] ss:$28 sps:$4 sm:$0xff]  }
 0x21b   :  { %v1921_v52 = vadd.f32 %v4671_v45, %v4343_v40  ;;  %v5131_v40 = vld [vmem:[%s7162_s8 + $0x384] ss:$28 sps:$4 sm:$0xff]  }
 0x21c   :  { %v5132_v45 = vld [vmem:[%s7162_s8 + $0x348] ss:$28 sps:$4 sm:$0xff]  }
 0x25b   :  { %v4688_v42 = vpop.f32.mrf.mxu1 }
 0x25d   :  { %v4689_v12 = vpop.f32.mrf.mxu1 }
 0x25e   :  { %v4690_v46 = vadd.f32 %v4689_v12, %v4688_v42  ;;  %v5129_v42 = vld [vmem:[%s7162_s8 + $0x380] ss:$28 sps:$4 sm:$0xff]   ;;  %v5134_v12 = vld [vmem:[%s7162_s8 + $0x34c] ss:$28 sps:$4 sm:$0xff]  }
 0x25f   :  { %v4691_v49 = vpop.f32.mrf.mxu1 }
 0x260   :  { %v1959_v50 = vadd.f32 %v4690_v46, %v1918_v43  ;;  %v5137_v43 = vld [vmem:[%s7162_s8 + $0x6cc] ss:$28 sps:$4 sm:$0xff]  }
 0x261   :  { %v4692_v51 = vpop.f32.mrf.mxu1  ;;  %v5135_v46 = vld [vmem:[%s7162_s8 + $0x6c8] ss:$28 sps:$4 sm:$0xff]  }
 0x262   :  { %v4638_v53 = vpack.c.bf16 %v1959_v50, %v1959_v50  ;;  %v1978_v55 = vadd.f32 %v1976_v48, %v1959_v50  ;;  %v4693_v56 = vadd.f32 %v4692_v51, %v4691_v49  ;;  %v5140_v48 = vld [vmem:[%s7162_s8 + $0x314] ss:$28 sps:$4 sm:$0xff]  }
 0x263   :  { %v5143_v49 = vld [vmem:[%s7162_s8 + $0x694] ss:$28 sps:$4 sm:$0xff]  }
 0x264   :  { %1974 = vst.msk [vmem:[#allocation4] sm:$0xf] %vm1973_vm1, %v4638_v53  ;;  %v4378_v58 = vmul.f32 -1.4285715, %v1978_v55  ;;  %v1962_v59 = vadd.f32 %v4693_v56, %v1921_v52  ;;  %v5138_v50 = vld [vmem:[%s7162_s8 + $0x310] ss:$28 sps:$4 sm:$0xff]  }
 0x265   :  { %v5141_v51 = vld [vmem:[%s7162_s8 + $0x690] ss:$28 sps:$4 sm:$0xff]   ;;  %v5146_v52 = vld [vmem:[%s7162_s8 + $0x2dc] ss:$28 sps:$4 sm:$0xff]  }
 0x266   :  { %v1984_v60 = vmul.f32 1.442695, %v4378_v58  ;;  %v4639_v61 = vpack.c.bf16 %v1962_v59, %v1962_v59  ;;  %v1979_v62 = vadd.f32 %v1977_v57, %v1962_v59  ;;  %v5149_v53 = vld [vmem:[%s7162_s8 + $0x65c] ss:$28 sps:$4 sm:$0xff]   ;;  %v5152_v57 = vld [vmem:[%s7162_s8 + $0x2a4] ss:$28 sps:$4 sm:$0xff]  }
 0x267   :  { %v5144_v55 = vld [vmem:[%s7162_s8 + $0x2d8] ss:$28 sps:$4 sm:$0xff]   ;;  %v5155_v58 = vld [vmem:[%s7162_s8 + $0x624] ss:$28 sps:$4 sm:$0xff]  }
 0x268   :  { %5404 = vpow2.f32 %v1984_v60  ;;  %1975 = vst.msk [vmem:[#allocation4 + $0x4] sm:$0xf] %vm1973_vm1, %v4639_v61  ;;  %v4379_v63 = vmul.f32 -1.4285715, %v1979_v62  ;;  %v5147_v56 = vld [vmem:[%s7162_s8 + $0x658] ss:$28 sps:$4 sm:$0xff]  }
 0x269   :  { %v5150_v59 = vld [vmem:[%s7162_s8 + $0x2a0] ss:$28 sps:$4 sm:$0xff]   ;;  %v5158_v61 = vld [vmem:[%s7162_s8 + $0x26c] ss:$28 sps:$4 sm:$0xff]  }
 0x26a   :  { %v1986_v0 = vmul.f32 1.442695, %v4379_v63  ;;  %v5153_v60 = vld [vmem:[%s7162_s8 + $0x620] ss:$28 sps:$4 sm:$0xff]   ;;  %v5161_v62 = vld [vmem:[%s7162_s8 + $0x5ec] ss:$28 sps:$4 sm:$0xff]  }
 0x26b   :  { %v5156_v63 = vld [vmem:[%s7162_s8 + $0x268] ss:$28 sps:$4 sm:$0xff]  }
 0x26c   :  { %5406 = vpow2.f32 %v1986_v0  ;;  %v5159_v0 = vld [vmem:[%s7162_s8 + $0x5e8] ss:$28 sps:$4 sm:$0xff]  }
 0x275   :  { %v5405_v1 = vpop.eup %5404 }
 0x276   :  { %v1988_v3 = vadd.f32 1.0, %v5405_v1  ;;  %v5164_v1 = vld [vmem:[%s7162_s8 + $0x234] ss:$28 sps:$4 sm:$0xff]  }
 0x278   :  { %5408 = vrcp.f32 %v1988_v3  ;;  %v5167_v3 = vld [vmem:[%s7162_s8 + $0x5b4] ss:$28 sps:$4 sm:$0xff]  }
 0x279   :  { %v5407_v4 = vpop.eup %5406 }
 0x27a   :  { %v1989_v7 = vadd.f32 1.0, %v5407_v4  ;;  %v5162_v4 = vld [vmem:[%s7162_s8 + $0x230] ss:$28 sps:$4 sm:$0xff]  }
 0x27c   :  { %5410 = vrcp.f32 %v1989_v7  ;;  %v5165_v7 = vld [vmem:[%s7162_s8 + $0x5b0] ss:$28 sps:$4 sm:$0xff]  }
 0x285   :  { %v5409_v9 = vpop.eup %5408 }
 0x286   :  { %v4640_v10 = vpack.c.bf16 %v5409_v9, %v5409_v9 }
 0x288   :  { %2002 = vst.msk [vmem:[#allocation6] sm:$0xf] %vm1973_vm1, %v4640_v10  ;;  %v5173_v10 = vld [vmem:[%s7162_s8 + $0x57c] ss:$28 sps:$4 sm:$0xff]  }
 0x289   :  { %v5411_v11 = vpop.eup %5410 }
 0x28a   :  { %v1994_v15 = vpack.c.bf16 %v5411_v11, %v5409_v9  ;;  %v4641_v18 = vpack.c.bf16 %v5411_v11, %v5411_v11  ;;  %v5170_v9 = vld [vmem:[%s7162_s8 + $0x1fc] ss:$28 sps:$4 sm:$0xff]  }
 0x28b   :  { %v5168_v11 = vld [vmem:[%s7162_s8 + $0x1f8] ss:$28 sps:$4 sm:$0xff]  }
 0x28c   :  { %4390 = vmatmul.mubr.msk.bf16.vlgmr.msra.gmra.mxu0 %vm2074_vm2, %v1994_v15  ;;  %4391 = vmatmul.mubr.msk.bf16.vlgmr.msra.gmra.mxu1 %vm2074_vm2, %v1994_v15  ;;  %2003 = vst.msk [vmem:[#allocation6 + $0x4] sm:$0xf] %vm1973_vm1, %v4641_v18  ;;  %v5179_v15 = vld [vmem:[%s7162_s8 + $0x544] ss:$28 sps:$4 sm:$0xff]   ;;  %v5182_v18 = vld [vmem:[%s7162_s8 + $0x194] ss:$28 sps:$4 sm:$0xff]  }
 0x28d   :  { %3622 = vmatpush1.bf16.msra.mxu0 %v5084_v14  ;;  %3665 = vmatpush1.bf16.msra.mxu1 %v5087_v8  ;;  %v5171_v14 = vld [vmem:[%s7162_s8 + $0x578] ss:$28 sps:$4 sm:$0xff]   ;;  %v5176_v8 = vld [vmem:[%s7162_s8 + $0x1c4] ss:$28 sps:$4 sm:$0xff]  }
 0x28e   :  { %3623 = vmatprep.subr.bf16.mxu0 %v5092_v16  ;;  %3666 = vmatprep.subr.bf16.mxu1 %v5095_v17  ;;  %v5174_v16 = vld [vmem:[%s7162_s8 + $0x1c0] ss:$28 sps:$4 sm:$0xff]  }
 0x28f   :  { %v5177_v17 = vld [vmem:[%s7162_s8 + $0x540] ss:$28 sps:$4 sm:$0xff]  }
 0x291   :  { %3624 = vmatpush1.bf16.msra.mxu0 %v5090_v19  ;;  %3667 = vmatpush1.bf16.msra.mxu1 %v5093_v20  ;;  %v5185_v19 = vld [vmem:[%s7162_s8 + $0x514] ss:$28 sps:$4 sm:$0xff]   ;;  %v2012_v20 = vld [vmem:[%s7161_s7] sm:$0xf] }
 0x292   :  { %3625 = vmatprep.subr.bf16.mxu0 %v5098_v22  ;;  %3668 = vmatprep.subr.bf16.mxu1 %v5101_v24 }
 0x295   :  { %3626 = vmatpush1.bf16.msra.mxu0 %v5096_v25  ;;  %3669 = vmatpush1.bf16.msra.mxu1 %v5099_v27  ;;  %v2021_v25 = vrot.slane %v2012_v20, %v6366_v5  ;;  %v2029_v27 = vrot.slane %v2012_v20, %v6378_v44 }
 0x296   :  { %3627 = vmatprep.subr.bf16.mxu0 %v5104_v28  ;;  %3670 = vmatprep.subr.bf16.mxu1 %v5107_v29  ;;  %v2017_v28 = vrot.slane %v2012_v20, %v6369_v6  ;;  %v2025_v29 = vrot.slane %v2012_v20, %v6381_v47  ;;  %v5224_v20 = vld [vmem:[%s7162_s8 + $0xc] ss:$28 sps:$4 sm:$0xff]  }
 0x299   :  { %3628 = vmatpush1.bf16.msra.mxu0 %v5102_v30  ;;  %3671 = vmatpush1.bf16.msra.mxu1 %v5105_v31 }
 0x29a   :  { %3629 = vmatprep.subr.bf16.mxu0 %v5110_v32  ;;  %3672 = vmatprep.subr.bf16.mxu1 %v5113_v33 }
 0x29d   :  { %3630 = vmatpush1.bf16.msra.mxu0 %v5108_v34  ;;  %3673 = vmatpush1.bf16.msra.mxu1 %v5111_v21 }
 0x29e   :  { %3631 = vmatprep.subr.bf16.mxu0 %v5116_v35  ;;  %3674 = vmatprep.subr.bf16.mxu1 %v5119_v36 }
 0x2a1   :  { %3632 = vmatpush1.bf16.msra.mxu0 %v5114_v37  ;;  %3675 = vmatpush1.bf16.msra.mxu1 %v5117_v13 }
 0x2a2   :  { %3633 = vmatprep.subr.bf16.mxu0 %v5122_v38  ;;  %3676 = vmatprep.subr.bf16.mxu1 %v5125_v39 }
 0x2a5   :  { %3634 = vmatpush1.bf16.msra.mxu0 %v5120_v54  ;;  %3677 = vmatpush1.bf16.msra.mxu1 %v5123_v23 }
 0x2a6   :  { %3635 = vmatprep.subr.bf16.mxu0 %v5128_v26  ;;  %3678 = vmatprep.subr.bf16.mxu1 %v5131_v40 }
 0x2a9   :  { %3636 = vmatpush1.bf16.msra.mxu0 %v5126_v41  ;;  %3679 = vmatpush1.bf16.msra.mxu1 %v5129_v42 }
 0x2aa   :  { %3637 = vmatprep.subr.bf16.mxu0 %v5134_v12  ;;  %3680 = vmatprep.subr.bf16.mxu1 %v5137_v43 }
 0x2ad   :  { %3638 = vmatpush2.bf16.msra.mxu0 %v5132_v45  ;;  %3681 = vmatpush2.bf16.msra.mxu1 %v5135_v46 }
 0x2ae   :  { %3639 = vmatprep.subr.bf16.mxu0 %v5140_v48  ;;  %3682 = vmatprep.subr.bf16.mxu1 %v5143_v49 }
 0x2b1   :  { %3640 = vmatpush2.bf16.msra.mxu0 %v5138_v50  ;;  %3683 = vmatpush2.bf16.msra.mxu1 %v5141_v51  ;;  %v5180_v50 = vld [vmem:[%s7162_s8 + $0x190] ss:$28 sps:$4 sm:$0xff]  }
 0x2b2   :  { %3641 = vmatprep.subr.bf16.mxu0 %v5146_v52  ;;  %3684 = vmatprep.subr.bf16.mxu1 %v5149_v53  ;;  %v5183_v51 = vld [vmem:[%s7162_s8 + $0x510] ss:$28 sps:$4 sm:$0xff]  }
 0x2b5   :  { %3642 = vmatpush2.bf16.msra.mxu0 %v5144_v55  ;;  %3685 = vmatpush2.bf16.msra.mxu1 %v5147_v56  ;;  %v5188_v55 = vld [vmem:[%s7162_s8 + $0x15c] ss:$28 sps:$4 sm:$0xff]  }
 0x2b6   :  { %3643 = vmatprep.subr.bf16.mxu0 %v5152_v57  ;;  %3686 = vmatprep.subr.bf16.mxu1 %v5155_v58  ;;  %v5191_v56 = vld [vmem:[%s7162_s8 + $0x4dc] ss:$28 sps:$4 sm:$0xff]  }
 0x2b7   :  { %v5186_v57 = vld [vmem:[%s7162_s8 + $0x158] ss:$28 sps:$4 sm:$0xff]  }
 0x2b8   :  { %v5189_v58 = vld [vmem:[%s7162_s8 + $0x4d8] ss:$28 sps:$4 sm:$0xff]  }
 0x2b9   :  { %3644 = vmatpush2.bf16.msra.mxu0 %v5150_v59  ;;  %3687 = vmatpush2.bf16.msra.mxu1 %v5153_v60  ;;  %v5194_v59 = vld [vmem:[%s7162_s8 + $0x124] ss:$28 sps:$4 sm:$0xff]  }
 0x2ba   :  { %3645 = vmatprep.subr.bf16.mxu0 %v5158_v61  ;;  %3688 = vmatprep.subr.bf16.mxu1 %v5161_v62  ;;  %v5197_v60 = vld [vmem:[%s7162_s8 + $0x4a4] ss:$28 sps:$4 sm:$0xff]  }
 0x2bb   :  { %v5192_v61 = vld [vmem:[%s7162_s8 + $0x120] ss:$28 sps:$4 sm:$0xff]  }
 0x2bc   :  { %v5195_v62 = vld [vmem:[%s7162_s8 + $0x4a0] ss:$28 sps:$4 sm:$0xff]  }
 0x2bd   :  { %3646 = vmatpush2.bf16.msra.mxu0 %v5156_v63  ;;  %3689 = vmatpush2.bf16.msra.mxu1 %v5159_v0  ;;  %v5200_v63 = vld [vmem:[%s7162_s8 + $0xec] ss:$28 sps:$4 sm:$0xff]  }
 0x2be   :  { %3647 = vmatprep.subr.bf16.mxu0 %v5164_v1  ;;  %3690 = vmatprep.subr.bf16.mxu1 %v5167_v3  ;;  %v5203_v0 = vld [vmem:[%s7162_s8 + $0x46c] ss:$28 sps:$4 sm:$0xff]  }
 0x2bf   :  { %v5198_v1 = vld [vmem:[%s7162_s8 + $0xe8] ss:$28 sps:$4 sm:$0xff]  }
 0x2c0   :  { %v5201_v3 = vld [vmem:[%s7162_s8 + $0x468] ss:$28 sps:$4 sm:$0xff]  }
 0x2c1   :  { %3648 = vmatpush2.bf16.msra.mxu0 %v5162_v4  ;;  %3691 = vmatpush2.bf16.msra.mxu1 %v5165_v7  ;;  %v5206_v4 = vld [vmem:[%s7162_s8 + $0xb4] ss:$28 sps:$4 sm:$0xff]  }
 0x2c2   :  { %3649 = vmatprep.subr.bf16.mxu0 %v5170_v9  ;;  %3692 = vmatprep.subr.bf16.mxu1 %v5173_v10  ;;  %v5209_v7 = vld [vmem:[%s7162_s8 + $0x434] ss:$28 sps:$4 sm:$0xff]  }
 0x2c3   :  { %v5204_v9 = vld [vmem:[%s7162_s8 + $0xb0] ss:$28 sps:$4 sm:$0xff]  }
 0x2c4   :  { %v5207_v10 = vld [vmem:[%s7162_s8 + $0x430] ss:$28 sps:$4 sm:$0xff]  }
 0x2c5   :  { %3650 = vmatpush2.bf16.msra.mxu0 %v5168_v11  ;;  %3693 = vmatpush2.bf16.msra.mxu1 %v5171_v14  ;;  %v5212_v11 = vld [vmem:[%s7162_s8 + $0x7c] ss:$28 sps:$4 sm:$0xff]  }
 0x2c6   :  { %3651 = vmatprep.subr.bf16.mxu0 %v5176_v8  ;;  %3694 = vmatprep.subr.bf16.mxu1 %v5179_v15  ;;  %v5215_v14 = vld [vmem:[%s7162_s8 + $0x3fc] ss:$28 sps:$4 sm:$0xff]  }
 0x2c7   :  { %v5210_v8 = vld [vmem:[%s7162_s8 + $0x78] ss:$28 sps:$4 sm:$0xff]  }
 0x2c8   :  { %v5213_v15 = vld [vmem:[%s7162_s8 + $0x3f8] ss:$28 sps:$4 sm:$0xff]  }
 0x2c9   :  { %3652 = vmatpush2.bf16.msra.mxu0 %v5174_v16  ;;  %3695 = vmatpush2.bf16.msra.mxu1 %v5177_v17  ;;  %v5218_v16 = vld [vmem:[%s7162_s8 + $0x44] ss:$28 sps:$4 sm:$0xff]  }
 0x2ca   :  { %3707 = vmatprep.subr.bf16.mxu0 %v5182_v18  ;;  %3750 = vmatprep.subr.bf16.mxu1 %v5185_v19  ;;  %v5221_v17 = vld [vmem:[%s7162_s8 + $0x3c4] ss:$28 sps:$4 sm:$0xff]  }
 0x2cb   :  { %v5216_v18 = vld [vmem:[%s7162_s8 + $0x40] ss:$28 sps:$4 sm:$0xff]  }
 0x2cc   :  { %v5219_v19 = vld [vmem:[%s7162_s8 + $0x3c0] ss:$28 sps:$4 sm:$0xff]  }
 0x34c   :  { %v2112_v22 = vpop.f32.mrf.mxu0  ;;  %v2155_v24 = vpop.f32.mrf.mxu1 }
 0x34d   :  { %v2113_v37 = vadd.f32 %v2112_v22, %v2017_v28  ;;  %v2156_v13 = vadd.f32 %v2155_v24, %v2025_v29  ;;  %v5227_v22 = vld [vmem:[%s7162_s8 + $0x38c] ss:$28 sps:$4 sm:$0xff]  }
 0x34e   :  { %v2114_v30 = vpop.f32.mrf.mxu0  ;;  %v2157_v31 = vpop.f32.mrf.mxu1  ;;  %v5222_v24 = vld [vmem:[%s7162_s8 + $0x8] ss:$28 sps:$4 sm:$0xff]  }
 0x34f   :  { %v2115_v34 = vadd.f32 %v2114_v30, %v2021_v25  ;;  %v2158_v21 = vadd.f32 %v2157_v31, %v2029_v27  ;;  %v2164_v45 = vmax.f32 %v2113_v37, 0.0  ;;  %v2166_v46 = vmax.f32 %v2156_v13, 0.0  ;;  %v5231_v30 = vld [vmem:[%s7162_s8 + $0x6d0] ss:$28 sps:$4 sm:$0xff]   ;;  %v5236_v31 = vld [vmem:[%s7162_s8 + $0x31c] ss:$28 sps:$4 sm:$0xff]  }
 0x350   :  { %v2116_v32 = vpop.f32.mrf.mxu0  ;;  %v2159_v33 = vpop.f32.mrf.mxu1  ;;  %v5243_v37 = vld [vmem:[%s7162_s8 + $0x660] ss:$28 sps:$4 sm:$0xff]   ;;  %v5248_v13 = vld [vmem:[%s7162_s8 + $0x2ac] ss:$28 sps:$4 sm:$0xff]  }
 0x351   :  { %v2117_v35 = vadd.f32 %v2116_v32, %v2017_v28  ;;  %v2160_v36 = vadd.f32 %v2159_v33, %v2025_v29  ;;  %v2165_v41 = vmax.f32 %v2115_v34, 0.0  ;;  %v2167_v42 = vmax.f32 %v2158_v21, 0.0  ;;  %v5233_v28 = vld [vmem:[%s7162_s8 + $0x6d4] ss:$28 sps:$4 sm:$0xff]   ;;  %v5239_v32 = vld [vmem:[%s7162_s8 + $0x69c] ss:$28 sps:$4 sm:$0xff]  }
 0x352   :  { %v2118_v38 = vpop.f32.mrf.mxu0  ;;  %v2161_v39 = vpop.f32.mrf.mxu1  ;;  %v5228_v29 = vld [vmem:[%s7162_s8 + $0x350] ss:$28 sps:$4 sm:$0xff]   ;;  %v5234_v33 = vld [vmem:[%s7162_s8 + $0x318] ss:$28 sps:$4 sm:$0xff]   ;;  %v5242_v21 = vld [vmem:[%s7162_s8 + $0x2e4] ss:$28 sps:$4 sm:$0xff]  }
 0x353   :  { %v2119_v54 = vadd.f32 %v2118_v38, %v2021_v25  ;;  %v2162_v23 = vadd.f32 %v2161_v39, %v2029_v27  ;;  %v2168_v26 = vmax.f32 %v2117_v35, 0.0  ;;  %v2170_v40 = vmax.f32 %v2160_v36, 0.0  ;;  %v5225_v25 = vld [vmem:[%s7162_s8 + $0x388] ss:$28 sps:$4 sm:$0xff]   ;;  %v5230_v27 = vld [vmem:[%s7162_s8 + $0x354] ss:$28 sps:$4 sm:$0xff]  }
 0x354   :  { %v5237_v34 = vld [vmem:[%s7162_s8 + $0x698] ss:$28 sps:$4 sm:$0xff]   ;;  %v5245_v35 = vld [vmem:[%s7162_s8 + $0x664] ss:$28 sps:$4 sm:$0xff]   ;;  %v5251_v38 = vld [vmem:[%s7162_s8 + $0x62c] ss:$28 sps:$4 sm:$0xff]  }
 0x355   :  { %v2169_v12 = vmax.f32 %v2119_v54, 0.0  ;;  %v2171_v43 = vmax.f32 %v2162_v23, 0.0  ;;  %v6638_v52 = vpack.c.bf16 %v2168_v26, %v2164_v45  ;;  %v6640_v53 = vpack.c.bf16 %v2170_v40, %v2166_v46  ;;  %v5240_v36 = vld [vmem:[%s7162_s8 + $0x2e0] ss:$28 sps:$4 sm:$0xff]   ;;  %v5246_v39 = vld [vmem:[%s7162_s8 + $0x2a8] ss:$28 sps:$4 sm:$0xff]  }
 0x356   :  { %v5249_v54 = vld [vmem:[%s7162_s8 + $0x628] ss:$28 sps:$4 sm:$0xff]   ;;  %v5254_v23 = vld [vmem:[%s7162_s8 + $0x274] ss:$28 sps:$4 sm:$0xff]  }
 0x357   :  { %v6628_v48 = vpack.c.bf16 %v2169_v12, %v2165_v41  ;;  %v6630_v49 = vpack.c.bf16 %v2171_v43, %v2167_v42  ;;  %v5257_v26 = vld [vmem:[%s7162_s8 + $0x5f4] ss:$28 sps:$4 sm:$0xff]   ;;  %v5260_v42 = vld [vmem:[%s7162_s8 + $0x23c] ss:$28 sps:$4 sm:$0xff]   ;;  %v5266_v46 = vld [vmem:[%s7162_s8 + $0x204] ss:$28 sps:$4 sm:$0xff]  }
 0x358   :  { %v5252_v40 = vld [vmem:[%s7162_s8 + $0x270] ss:$28 sps:$4 sm:$0xff]   ;;  %v5263_v12 = vld [vmem:[%s7162_s8 + $0x5bc] ss:$28 sps:$4 sm:$0xff]  }
 0x359   :  { %3653 = vmatprep.mubr.bf16.mxu0 %v6628_v48  ;;  %3696 = vmatprep.mubr.bf16.mxu1 %v6630_v49  ;;  %v5255_v41 = vld [vmem:[%s7162_s8 + $0x5f0] ss:$28 sps:$4 sm:$0xff]   ;;  %v5258_v43 = vld [vmem:[%s7162_s8 + $0x238] ss:$28 sps:$4 sm:$0xff]  }
 0x35a   :  { %3654 = vmatmul.mubr.bf16.vlgmr.msra.gmra.mxu0 %v6638_v52  ;;  %3697 = vmatmul.mubr.bf16.vlgmr.msra.gmra.mxu1 %v6640_v53  ;;  %v5261_v45 = vld [vmem:[%s7162_s8 + $0x5b8] ss:$28 sps:$4 sm:$0xff]  }
 0x35b   :  { %3708 = vmatpush1.bf16.msra.mxu0 %v5180_v50  ;;  %3751 = vmatpush1.bf16.msra.mxu1 %v5183_v51  ;;  %v5269_v50 = vld [vmem:[%s7162_s8 + $0x584] ss:$28 sps:$4 sm:$0xff]  }
 0x35c   :  { %3739 = vmatprep.mubr.bf16.mxu0 %v6628_v48  ;;  %3782 = vmatprep.mubr.bf16.mxu1 %v6630_v49  ;;  %v5264_v51 = vld [vmem:[%s7162_s8 + $0x200] ss:$28 sps:$4 sm:$0xff]  }
 0x35d   :  { %3709 = vmatprep.subr.bf16.mxu0 %v5188_v55  ;;  %3752 = vmatprep.subr.bf16.mxu1 %v5191_v56  ;;  %v5267_v55 = vld [vmem:[%s7162_s8 + $0x580] ss:$28 sps:$4 sm:$0xff]   ;;  %v5272_v56 = vld [vmem:[%s7162_s8 + $0x1cc] ss:$28 sps:$4 sm:$0xff]  }
 0x35f   :  { %3710 = vmatpush1.bf16.msra.mxu0 %v5186_v57  ;;  %3753 = vmatpush1.bf16.msra.mxu1 %v5189_v58  ;;  %v5275_v57 = vld [vmem:[%s7162_s8 + $0x54c] ss:$28 sps:$4 sm:$0xff]  }
 0x360   :  { %3711 = vmatprep.subr.bf16.mxu0 %v5194_v59  ;;  %3754 = vmatprep.subr.bf16.mxu1 %v5197_v60  ;;  %v5270_v58 = vld [vmem:[%s7162_s8 + $0x1c8] ss:$28 sps:$4 sm:$0xff]   ;;  %v5278_v60 = vld [vmem:[%s7162_s8 + $0x19c] ss:$28 sps:$4 sm:$0xff]  }
 0x361   :  { %v5273_v59 = vld [vmem:[%s7162_s8 + $0x548] ss:$28 sps:$4 sm:$0xff]  }
 0x363   :  { %3712 = vmatpush1.bf16.msra.mxu0 %v5192_v61  ;;  %3755 = vmatpush1.bf16.msra.mxu1 %v5195_v62  ;;  %v5281_v61 = vld [vmem:[%s7162_s8 + $0x51c] ss:$28 sps:$4 sm:$0xff]  }
 0x364   :  { %3713 = vmatprep.subr.bf16.mxu0 %v5200_v63  ;;  %3756 = vmatprep.subr.bf16.mxu1 %v5203_v0  ;;  %v5276_v62 = vld [vmem:[%s7162_s8 + $0x198] ss:$28 sps:$4 sm:$0xff]   ;;  %v5284_v0 = vld [vmem:[%s7162_s8 + $0x164] ss:$28 sps:$4 sm:$0xff]  }
 0x365   :  { %v5279_v63 = vld [vmem:[%s7162_s8 + $0x518] ss:$28 sps:$4 sm:$0xff]  }
 0x367   :  { %3714 = vmatpush1.bf16.msra.mxu0 %v5198_v1  ;;  %3757 = vmatpush1.bf16.msra.mxu1 %v5201_v3  ;;  %v5287_v1 = vld [vmem:[%s7162_s8 + $0x4e4] ss:$28 sps:$4 sm:$0xff]  }
 0x368   :  { %3715 = vmatprep.subr.bf16.mxu0 %v5206_v4  ;;  %3758 = vmatprep.subr.bf16.mxu1 %v5209_v7  ;;  %v5282_v3 = vld [vmem:[%s7162_s8 + $0x160] ss:$28 sps:$4 sm:$0xff]   ;;  %v5290_v7 = vld [vmem:[%s7162_s8 + $0x12c] ss:$28 sps:$4 sm:$0xff]  }
 0x369   :  { %v5285_v4 = vld [vmem:[%s7162_s8 + $0x4e0] ss:$28 sps:$4 sm:$0xff]  }
 0x36b   :  { %3716 = vmatpush1.bf16.msra.mxu0 %v5204_v9  ;;  %3759 = vmatpush1.bf16.msra.mxu1 %v5207_v10  ;;  %v5293_v9 = vld [vmem:[%s7162_s8 + $0x4ac] ss:$28 sps:$4 sm:$0xff]  }
 0x36c   :  { %3717 = vmatprep.subr.bf16.mxu0 %v5212_v11  ;;  %3760 = vmatprep.subr.bf16.mxu1 %v5215_v14  ;;  %v5288_v10 = vld [vmem:[%s7162_s8 + $0x128] ss:$28 sps:$4 sm:$0xff]   ;;  %v5296_v14 = vld [vmem:[%s7162_s8 + $0xf4] ss:$28 sps:$4 sm:$0xff]  }
 0x36d   :  { %v5291_v11 = vld [vmem:[%s7162_s8 + $0x4a8] ss:$28 sps:$4 sm:$0xff]  }
 0x36f   :  { %3718 = vmatpush1.bf16.msra.mxu0 %v5210_v8  ;;  %3761 = vmatpush1.bf16.msra.mxu1 %v5213_v15  ;;  %v5299_v8 = vld [vmem:[%s7162_s8 + $0x474] ss:$28 sps:$4 sm:$0xff]  }
 0x370   :  { %3719 = vmatprep.subr.bf16.mxu0 %v5218_v16  ;;  %3762 = vmatprep.subr.bf16.mxu1 %v5221_v17  ;;  %v5294_v15 = vld [vmem:[%s7162_s8 + $0xf0] ss:$28 sps:$4 sm:$0xff]   ;;  %v5302_v17 = vld [vmem:[%s7162_s8 + $0xbc] ss:$28 sps:$4 sm:$0xff]  }
 0x371   :  { %v5297_v16 = vld [vmem:[%s7162_s8 + $0x470] ss:$28 sps:$4 sm:$0xff]  }
 0x373   :  { %3720 = vmatpush1.bf16.msra.mxu0 %v5216_v18  ;;  %3763 = vmatpush1.bf16.msra.mxu1 %v5219_v19  ;;  %v5305_v18 = vld [vmem:[%s7162_s8 + $0x43c] ss:$28 sps:$4 sm:$0xff]  }
 0x374   :  { %3721 = vmatprep.subr.bf16.mxu0 %v5224_v20  ;;  %3764 = vmatprep.subr.bf16.mxu1 %v5227_v22  ;;  %v5300_v19 = vld [vmem:[%s7162_s8 + $0xb8] ss:$28 sps:$4 sm:$0xff]   ;;  %v5308_v22 = vld [vmem:[%s7162_s8 + $0x84] ss:$28 sps:$4 sm:$0xff]  }
 0x375   :  { %v5303_v20 = vld [vmem:[%s7162_s8 + $0x438] ss:$28 sps:$4 sm:$0xff]  }
 0x377   :  { %3722 = vmatpush1.bf16.msra.mxu0 %v5222_v24  ;;  %3765 = vmatpush1.bf16.msra.mxu1 %v5225_v25  ;;  %v5311_v24 = vld [vmem:[%s7162_s8 + $0x404] ss:$28 sps:$4 sm:$0xff]  }
 0x378   :  { %3723 = vmatprep.subr.bf16.mxu0 %v5230_v27  ;;  %3766 = vmatprep.subr.bf16.mxu1 %v5233_v28  ;;  %v5306_v25 = vld [vmem:[%s7162_s8 + $0x80] ss:$28 sps:$4 sm:$0xff]   ;;  %v5314_v28 = vld [vmem:[%s7162_s8 + $0x4c] ss:$28 sps:$4 sm:$0xff]  }
 0x379   :  { %v5309_v27 = vld [vmem:[%s7162_s8 + $0x400] ss:$28 sps:$4 sm:$0xff]  }
 0x37b   :  { %3724 = vmatpush2.bf16.msra.mxu0 %v5228_v29  ;;  %3767 = vmatpush2.bf16.msra.mxu1 %v5231_v30  ;;  %v5317_v29 = vld [vmem:[%s7162_s8 + $0x3cc] ss:$28 sps:$4 sm:$0xff]  }
 0x37c   :  { %3725 = vmatprep.subr.bf16.mxu0 %v5236_v31  ;;  %3768 = vmatprep.subr.bf16.mxu1 %v5239_v32  ;;  %v5312_v30 = vld [vmem:[%s7162_s8 + $0x48] ss:$28 sps:$4 sm:$0xff]   ;;  %v5320_v32 = vld [vmem:[%s7162_s8 + $0x14] ss:$28 sps:$4 sm:$0xff]  }
 0x37d   :  { %v5315_v31 = vld [vmem:[%s7162_s8 + $0x3c8] ss:$28 sps:$4 sm:$0xff]  }
 0x37f   :  { %3726 = vmatpush2.bf16.msra.mxu0 %v5234_v33  ;;  %3769 = vmatpush2.bf16.msra.mxu1 %v5237_v34  ;;  %v5323_v33 = vld [vmem:[%s7162_s8 + $0x394] ss:$28 sps:$4 sm:$0xff]  }
 0x380   :  { %3727 = vmatprep.subr.bf16.mxu0 %v5242_v21  ;;  %3770 = vmatprep.subr.bf16.mxu1 %v5245_v35  ;;  %v5318_v34 = vld [vmem:[%s7162_s8 + $0x10] ss:$28 sps:$4 sm:$0xff]   ;;  %v5326_v35 = vld [vmem:[%s7162_s8 + $0x35c] ss:$28 sps:$4 sm:$0xff]  }
 0x381   :  { %v5321_v21 = vld [vmem:[%s7162_s8 + $0x390] ss:$28 sps:$4 sm:$0xff]  }
 0x383   :  { %3728 = vmatpush2.bf16.msra.mxu0 %v5240_v36  ;;  %3771 = vmatpush2.bf16.msra.mxu1 %v5243_v37  ;;  %v5329_v36 = vld [vmem:[%s7162_s8 + $0x6dc] ss:$28 sps:$4 sm:$0xff]  }
 0x384   :  { %3729 = vmatprep.subr.bf16.mxu0 %v5248_v13  ;;  %3772 = vmatprep.subr.bf16.mxu1 %v5251_v38  ;;  %v5324_v37 = vld [vmem:[%s7162_s8 + $0x358] ss:$28 sps:$4 sm:$0xff]   ;;  %v5332_v38 = vld [vmem:[%s7162_s8 + $0x324] ss:$28 sps:$4 sm:$0xff]  }
 0x385   :  { %v5327_v13 = vld [vmem:[%s7162_s8 + $0x6d8] ss:$28 sps:$4 sm:$0xff]  }
 0x387   :  { %3730 = vmatpush2.bf16.msra.mxu0 %v5246_v39  ;;  %3773 = vmatpush2.bf16.msra.mxu1 %v5249_v54  ;;  %v5335_v39 = vld [vmem:[%s7162_s8 + $0x6a4] ss:$28 sps:$4 sm:$0xff]  }
 0x388   :  { %3731 = vmatprep.subr.bf16.mxu0 %v5254_v23  ;;  %3774 = vmatprep.subr.bf16.mxu1 %v5257_v26  ;;  %v5330_v54 = vld [vmem:[%s7162_s8 + $0x320] ss:$28 sps:$4 sm:$0xff]   ;;  %v5338_v26 = vld [vmem:[%s7162_s8 + $0x2ec] ss:$28 sps:$4 sm:$0xff]  }
 0x389   :  { %v5333_v23 = vld [vmem:[%s7162_s8 + $0x6a0] ss:$28 sps:$4 sm:$0xff]  }
 0x38b   :  { %3732 = vmatpush2.bf16.msra.mxu0 %v5252_v40  ;;  %3775 = vmatpush2.bf16.msra.mxu1 %v5255_v41  ;;  %v5341_v40 = vld [vmem:[%s7162_s8 + $0x66c] ss:$28 sps:$4 sm:$0xff]  }
 0x38c   :  { %3733 = vmatprep.subr.bf16.mxu0 %v5260_v42  ;;  %3776 = vmatprep.subr.bf16.mxu1 %v5263_v12  ;;  %v5336_v41 = vld [vmem:[%s7162_s8 + $0x2e8] ss:$28 sps:$4 sm:$0xff]   ;;  %v5344_v12 = vld [vmem:[%s7162_s8 + $0x2b4] ss:$28 sps:$4 sm:$0xff]  }
 0x38d   :  { %v5339_v42 = vld [vmem:[%s7162_s8 + $0x668] ss:$28 sps:$4 sm:$0xff]  }
 0x38f   :  { %3734 = vmatpush2.bf16.msra.mxu0 %v5258_v43  ;;  %3777 = vmatpush2.bf16.msra.mxu1 %v5261_v45  ;;  %v5347_v43 = vld [vmem:[%s7162_s8 + $0x634] ss:$28 sps:$4 sm:$0xff]  }
 0x390   :  { %3735 = vmatprep.subr.bf16.mxu0 %v5266_v46  ;;  %3778 = vmatprep.subr.bf16.mxu1 %v5269_v50  ;;  %v5342_v45 = vld [vmem:[%s7162_s8 + $0x2b0] ss:$28 sps:$4 sm:$0xff]   ;;  %v5350_v50 = vld [vmem:[%s7162_s8 + $0x27c] ss:$28 sps:$4 sm:$0xff]  }
 0x391   :  { %v5345_v46 = vld [vmem:[%s7162_s8 + $0x630] ss:$28 sps:$4 sm:$0xff]  }
 0x393   :  { %3736 = vmatpush2.bf16.msra.mxu0 %v5264_v51  ;;  %3779 = vmatpush2.bf16.msra.mxu1 %v5267_v55  ;;  %v5353_v51 = vld [vmem:[%s7162_s8 + $0x5fc] ss:$28 sps:$4 sm:$0xff]  }
 0x394   :  { %3737 = vmatprep.subr.bf16.mxu0 %v5272_v56  ;;  %3780 = vmatprep.subr.bf16.mxu1 %v5275_v57  ;;  %v5348_v55 = vld [vmem:[%s7162_s8 + $0x278] ss:$28 sps:$4 sm:$0xff]   ;;  %v5356_v57 = vld [vmem:[%s7162_s8 + $0x244] ss:$28 sps:$4 sm:$0xff]  }
 0x395   :  { %v5351_v56 = vld [vmem:[%s7162_s8 + $0x5f8] ss:$28 sps:$4 sm:$0xff]  }
 0x397   :  { %3738 = vmatpush2.bf16.msra.mxu0 %v5270_v58  ;;  %3781 = vmatpush2.bf16.msra.mxu1 %v5273_v59  ;;  %v5359_v58 = vld [vmem:[%s7162_s8 + $0x5c4] ss:$28 sps:$4 sm:$0xff]  }
 0x398   :  { %3793 = vmatprep.subr.bf16.mxu0 %v5278_v60  ;;  %3836 = vmatprep.subr.bf16.mxu1 %v5281_v61  ;;  %v5354_v59 = vld [vmem:[%s7162_s8 + $0x240] ss:$28 sps:$4 sm:$0xff]   ;;  %v5362_v61 = vld [vmem:[%s7162_s8 + $0x20c] ss:$28 sps:$4 sm:$0xff]  }
 0x399   :  { %v5357_v60 = vld [vmem:[%s7162_s8 + $0x5c0] ss:$28 sps:$4 sm:$0xff]  }
 0x39a   :  { %3740 = vmatmul.mubr.bf16.vlgmr.msra.gmra.mxu0 %v6638_v52  ;;  %3783 = vmatmul.mubr.bf16.vlgmr.msra.gmra.mxu1 %v6640_v53 }
 0x39b   :  { %3794 = vmatpush1.bf16.msra.mxu0 %v5276_v62  ;;  %3825 = vmatprep.mubr.bf16.mxu0 %v6628_v48  ;;  %v5365_v62 = vld [vmem:[%s7162_s8 + $0x58c] ss:$28 sps:$4 sm:$0xff]  }
 0x39c   :  { %3837 = vmatpush1.bf16.msra.mxu1 %v5279_v63  ;;  %3868 = vmatprep.mubr.bf16.mxu1 %v6630_v49  ;;  %v5360_v63 = vld [vmem:[%s7162_s8 + $0x208] ss:$28 sps:$4 sm:$0xff]  }
 0x39d   :  { %3795 = vmatprep.subr.bf16.mxu0 %v5284_v0  ;;  %3838 = vmatprep.subr.bf16.mxu1 %v5287_v1  ;;  %v5363_v0 = vld [vmem:[%s7162_s8 + $0x588] ss:$28 sps:$4 sm:$0xff]   ;;  %v5368_v1 = vld [vmem:[%s7162_s8 + $0x1d4] ss:$28 sps:$4 sm:$0xff]  }
 0x39f   :  { %3796 = vmatpush1.bf16.msra.mxu0 %v5282_v3  ;;  %v5371_v3 = vld [vmem:[%s7162_s8 + $0x554] ss:$28 sps:$4 sm:$0xff]  }
 0x3a0   :  { %3839 = vmatpush1.bf16.msra.mxu1 %v5285_v4  ;;  %3797 = vmatprep.subr.bf16.mxu0 %v5290_v7  ;;  %v5366_v4 = vld [vmem:[%s7162_s8 + $0x1d0] ss:$28 sps:$4 sm:$0xff]  }
 0x3a1   :  { %3840 = vmatprep.subr.bf16.mxu1 %v5293_v9  ;;  %v5369_v7 = vld [vmem:[%s7162_s8 + $0x550] ss:$28 sps:$4 sm:$0xff]   ;;  %v5372_v9 = vld [vmem:[%s7162_s8 + $0x360] ss:$28 sps:$4 sm:$0xff]  }
 0x3a3   :  { %3798 = vmatpush1.bf16.msra.mxu0 %v5288_v10  ;;  %v5373_v10 = vld [vmem:[%s7162_s8 + $0x6e0] ss:$28 sps:$4 sm:$0xff]  }
 0x3a4   :  { %3841 = vmatpush1.bf16.msra.mxu1 %v5291_v11  ;;  %3799 = vmatprep.subr.bf16.mxu0 %v5296_v14  ;;  %v5374_v11 = vld [vmem:[%s7162_s8 + $0x1a0] ss:$28 sps:$4 sm:$0xff]  }
 0x3a5   :  { %3842 = vmatprep.subr.bf16.mxu1 %v5299_v8  ;;  %v5375_v14 = vld [vmem:[%s7162_s8 + $0x520] ss:$28 sps:$4 sm:$0xff]   ;;  %v5376_v8 = vld [vmem:[%s7162_s8 + $0x328] ss:$28 sps:$4 sm:$0xff]  }
 0x3a7   :  { %3800 = vmatpush1.bf16.msra.mxu0 %v5294_v15  ;;  %v5377_v15 = vld [vmem:[%s7162_s8 + $0x6a8] ss:$28 sps:$4 sm:$0xff]  }
 0x3a8   :  { %3843 = vmatpush1.bf16.msra.mxu1 %v5297_v16  ;;  %3801 = vmatprep.subr.bf16.mxu0 %v5302_v17  ;;  %v5378_v16 = vld [vmem:[%s7162_s8 + $0x168] ss:$28 sps:$4 sm:$0xff]  }
 0x3a9   :  { %3844 = vmatprep.subr.bf16.mxu1 %v5305_v18  ;;  %v5379_v17 = vld [vmem:[%s7162_s8 + $0x4e8] ss:$28 sps:$4 sm:$0xff]   ;;  %v5380_v18 = vld [vmem:[%s7162_s8 + $0x2f0] ss:$28 sps:$4 sm:$0xff]  }
 0x3ab   :  { %3802 = vmatpush1.bf16.msra.mxu0 %v5300_v19  ;;  %v5381_v19 = vld [vmem:[%s7162_s8 + $0x670] ss:$28 sps:$4 sm:$0xff]  }
 0x3ac   :  { %3845 = vmatpush1.bf16.msra.mxu1 %v5303_v20  ;;  %3803 = vmatprep.subr.bf16.mxu0 %v5308_v22  ;;  %v5383_v20 = vld [vmem:[%s7162_s8 + $0x4b0] ss:$28 sps:$4 sm:$0xff]   ;;  %v5385_v22 = vld [vmem:[%s7162_s8 + $0x638] ss:$28 sps:$4 sm:$0xff]  }
 0x3ad   :  { %3846 = vmatprep.subr.bf16.mxu1 %v5311_v24  ;;  %v5386_v24 = vld [vmem:[%s7162_s8 + $0xf8] ss:$28 sps:$4 sm:$0xff]  }
 0x3af   :  { %3804 = vmatpush1.bf16.msra.mxu0 %v5306_v25  ;;  %v5387_v25 = vld [vmem:[%s7162_s8 + $0x478] ss:$28 sps:$4 sm:$0xff]  }
 0x3b0   :  { %3847 = vmatpush1.bf16.msra.mxu1 %v5309_v27  ;;  %3805 = vmatprep.subr.bf16.mxu0 %v5314_v28  ;;  %v5388_v27 = vld [vmem:[%s7162_s8 + $0x280] ss:$28 sps:$4 sm:$0xff]  }
 0x3b1   :  { %3848 = vmatprep.subr.bf16.mxu1 %v5317_v29  ;;  %v5389_v28 = vld [vmem:[%s7162_s8 + $0x600] ss:$28 sps:$4 sm:$0xff]  }
 0x3b2   :  { %v5390_v29 = vld [vmem:[%s7162_s8 + $0xc0] ss:$28 sps:$4 sm:$0xff]  }
 0x3b3   :  { %3806 = vmatpush1.bf16.msra.mxu0 %v5312_v30  ;;  %v5391_v30 = vld [vmem:[%s7162_s8 + $0x440] ss:$28 sps:$4 sm:$0xff]  }
 0x3b4   :  { %3849 = vmatpush1.bf16.msra.mxu1 %v5315_v31  ;;  %3807 = vmatprep.subr.bf16.mxu0 %v5320_v32  ;;  %v5392_v31 = vld [vmem:[%s7162_s8 + $0x248] ss:$28 sps:$4 sm:$0xff]  }
 0x3b5   :  { %3850 = vmatprep.subr.bf16.mxu1 %v5323_v33  ;;  %v5393_v32 = vld [vmem:[%s7162_s8 + $0x5c8] ss:$28 sps:$4 sm:$0xff]  }
 0x3b6   :  { %v5394_v33 = vld [vmem:[%s7162_s8 + $0x88] ss:$28 sps:$4 sm:$0xff]  }
 0x3b7   :  { %3808 = vmatpush1.bf16.msra.mxu0 %v5318_v34  ;;  %v5395_v34 = vld [vmem:[%s7162_s8 + $0x408] ss:$28 sps:$4 sm:$0xff]  }
 0x3b8   :  { %3851 = vmatpush1.bf16.msra.mxu1 %v5321_v21  ;;  %3809 = vmatprep.subr.bf16.mxu0 %v5326_v35  ;;  %v5396_v21 = vld [vmem:[%s7162_s8 + $0x210] ss:$28 sps:$4 sm:$0xff]  }
 0x3b9   :  { %3852 = vmatprep.subr.bf16.mxu1 %v5329_v36  ;;  %v5397_v35 = vld [vmem:[%s7162_s8 + $0x590] ss:$28 sps:$4 sm:$0xff]  }
 0x3ba   :  { %v5398_v36 = vld [vmem:[%s7162_s8 + $0x50] ss:$28 sps:$4 sm:$0xff]  }
 0x3bb   :  { %3810 = vmatpush2.bf16.msra.mxu0 %v5324_v37  ;;  %v5399_v37 = vld [vmem:[%s7162_s8 + $0x3d0] ss:$28 sps:$4 sm:$0xff]  }
 0x3bc   :  { %3853 = vmatpush2.bf16.msra.mxu1 %v5327_v13  ;;  %3811 = vmatprep.subr.bf16.mxu0 %v5332_v38  ;;  %v5400_v13 = vld [vmem:[%s7162_s8 + $0x1d8] ss:$28 sps:$4 sm:$0xff]  }
 0x3bd   :  { %3854 = vmatprep.subr.bf16.mxu1 %v5335_v39  ;;  %v5401_v38 = vld [vmem:[%s7162_s8 + $0x558] ss:$28 sps:$4 sm:$0xff]  }
 0x3be   :  { %v5402_v39 = vld [vmem:[%s7162_s8 + $0x18] ss:$28 sps:$4 sm:$0xff]  }
 0x3bf   :  { %3812 = vmatpush2.bf16.msra.mxu0 %v5330_v54  ;;  %v5403_v54 = vld [vmem:[%s7162_s8 + $0x398] ss:$28 sps:$4 sm:$0xff]  }
 0x3c0   :  { %3855 = vmatpush2.bf16.msra.mxu1 %v5333_v23  ;;  %3813 = vmatprep.subr.bf16.mxu0 %v5338_v26  ;;  %v7129_v23 = vld [vmem:[%s7163_s9] sm:$0x7f] }
 0x3c1   :  { %3856 = vmatprep.subr.bf16.mxu1 %v5341_v40  ;;  %v2437_v26 = vrot.slane %v7129_v23, %v6369_v6  ;;  %v2441_v40 = vrot.slane %v7129_v23, %v6366_v5 }
 0x3c3   :  { %3814 = vmatpush2.bf16.msra.mxu0 %v5336_v41 }
 0x3c4   :  { %3857 = vmatpush2.bf16.msra.mxu1 %v5339_v42  ;;  %3815 = vmatprep.subr.bf16.mxu0 %v5344_v12 }
 0x3c5   :  { %3858 = vmatprep.subr.bf16.mxu1 %v5347_v43 }
 0x3c7   :  { %3816 = vmatpush2.bf16.msra.mxu0 %v5342_v45 }
 0x3c8   :  { %3859 = vmatpush2.bf16.msra.mxu1 %v5345_v46  ;;  %3817 = vmatprep.subr.bf16.mxu0 %v5350_v50 }
 0x3c9   :  { %3860 = vmatprep.subr.bf16.mxu1 %v5353_v51 }
 0x3cb   :  { %3818 = vmatpush2.bf16.msra.mxu0 %v5348_v55 }
 0x3cc   :  { %3861 = vmatpush2.bf16.msra.mxu1 %v5351_v56  ;;  %3819 = vmatprep.subr.bf16.mxu0 %v5356_v57 }
 0x3cd   :  { %3862 = vmatprep.subr.bf16.mxu1 %v5359_v58 }
 0x3cf   :  { %3820 = vmatpush2.bf16.msra.mxu0 %v5354_v59 }
 0x3d0   :  { %3863 = vmatpush2.bf16.msra.mxu1 %v5357_v60  ;;  %3821 = vmatprep.subr.bf16.mxu0 %v5362_v61 }
 0x3d1   :  { %3864 = vmatprep.subr.bf16.mxu1 %v5365_v62 }
 0x3d3   :  { %3822 = vmatpush2.bf16.msra.mxu0 %v5360_v63 }
 0x3d4   :  { %3865 = vmatpush2.bf16.msra.mxu1 %v5363_v0  ;;  %3823 = vmatprep.subr.bf16.mxu0 %v5368_v1 }
 0x3d5   :  { %3866 = vmatprep.subr.bf16.mxu1 %v5371_v3 }
 0x3d7   :  { %3824 = vmatpush2.bf16.msra.mxu0 %v5366_v4 }
 0x3d8   :  { %3867 = vmatpush2.bf16.msra.mxu1 %v5369_v7  ;;  %4694 = vmatprep.subr.bf16.mxu0 %v5372_v9 }
 0x3d9   :  { %4716 = vmatprep.subr.bf16.mxu1 %v5373_v10 }
 0x3da   :  { %3826 = vmatmul.mubr.bf16.vlgmr.msra.gmra.mxu0 %v6638_v52 }
 0x3db   :  { %3869 = vmatmul.mubr.bf16.vlgmr.msra.gmra.mxu1 %v6640_v53  ;;  %4695 = vmatpush3.bf16.msra.mxu0 %v5374_v11 }
 0x3dc   :  { %3911 = vmatprep.mubr.bf16.mxu0 %v6628_v48  ;;  %4717 = vmatpush3.bf16.msra.mxu1 %v5375_v14  ;;  %v5382_v48 = vld [vmem:[%s7162_s8 + $0x130] ss:$28 sps:$4 sm:$0xff]  }
 0x3dd   :  { %3952 = vmatprep.mubr.bf16.mxu1 %v6630_v49  ;;  %4696 = vmatprep.subr.bf16.mxu0 %v5376_v8  ;;  %v5384_v49 = vld [vmem:[%s7162_s8 + $0x2b8] ss:$28 sps:$4 sm:$0xff]   ;;  %s5533_s8 = smov [#allocation4]  }
 0x3de   :  { %4718 = vmatprep.subr.bf16.mxu1 %v5377_v15  ;;  %s4115_s9 = sshll.u32 %s5533_s8, 4  ;;  %s4116_s9 = int_to_ptr.vmem [resolvable:$true] %s4115_s9 }
 0x3df   :  { %4697 = vmatpush3.bf16.msra.mxu0 %v5378_v16  ;;  %s5468_s15 = scalar_lea.vmem %s4116_s9, 128  ;;  %p5473_p1 = scmp.lt.s32.totalorder %s4116_s9, %s4116_s9 }
 0x3e0   :  { %4719 = vmatpush3.bf16.msra.mxu1 %v5379_v17  ;;  %4698 = vmatprep.subr.bf16.mxu0 %v5380_v18  ;;  %v2445_v18 = vrot.slane %v7129_v23, %v6381_v47  ;;  %p5469_p0 = scmp.ne.s32.totalorder %s4116_s9, %s5468_s15  ;;  %p5474_p2 = scmp.lt.s32.totalorder %s5468_s15, %s5468_s15 }
 0x3e1   :  { %4720 = vmatprep.subr.bf16.mxu1 %v5381_v19  ;;  %v2449_v19 = vrot.slane %v7129_v23, %v6378_v44 }
 0x3e2   :  { %p5475_p3 = por %p5474_p2, %p5473_p1 }
 0x3e3   :  { %4699 = vmatpush3.bf16.msra.mxu0 %v5382_v48 }
 0x3e4   :  { %4721 = vmatpush3.bf16.msra.mxu1 %v5383_v20  ;;  %4700 = vmatprep.subr.bf16.mxu0 %v5384_v49  ;;  %p5476_p4 = pnand %p5475_p3, %p5469_p0 }
 0x3e5   :  { %4722 = vmatprep.subr.bf16.mxu1 %v5385_v22 }
 0x3e7   :  { %4701 = vmatpush3.bf16.msra.mxu0 %v5386_v24 }
 0x3e8   :  { %4723 = vmatpush3.bf16.msra.mxu1 %v5387_v25  ;;  %4702 = vmatprep.subr.bf16.mxu0 %v5388_v27 }
 0x3e9   :  { %4724 = vmatprep.subr.bf16.mxu1 %v5389_v28 }
 0x3eb   :  { %4703 = vmatpush3.bf16.msra.mxu0 %v5390_v29 }
 0x3ec   :  { %4725 = vmatpush3.bf16.msra.mxu1 %v5391_v30  ;;  %4704 = vmatprep.subr.bf16.mxu0 %v5392_v31 }
 0x3ed   :  { %4726 = vmatprep.subr.bf16.mxu1 %v5393_v32 }
 0x3ef   :  { %4705 = vmatpush3.bf16.msra.mxu0 %v5394_v33 }
 0x3f0   :  { %4727 = vmatpush3.bf16.msra.mxu1 %v5395_v34  ;;  %4706 = vmatprep.subr.bf16.mxu0 %v5396_v21 }
 0x3f1   :  { %4728 = vmatprep.subr.bf16.mxu1 %v5397_v35 }
 0x3f3   :  { %4707 = vmatpush3.bf16.msra.mxu0 %v5398_v36 }
 0x3f4   :  { %4729 = vmatpush3.bf16.msra.mxu1 %v5399_v37  ;;  %4708 = vmatprep.subr.bf16.mxu0 %v5400_v13 }
 0x3f5   :  { %4730 = vmatprep.subr.bf16.mxu1 %v5401_v38 }
 0x3f7   :  { %4709 = vmatpush3.bf16.msra.mxu0 %v5402_v39 }
 0x3f8   :  { %4731 = vmatpush3.bf16.msra.mxu1 %v5403_v54 }
 0x3fa   :  { %3912 = vmatmul.mubr.bf16.vlgmr.msra.gmra.mxu0 %v6638_v52 }
 0x3fb   :  { %3953 = vmatmul.mubr.bf16.vlgmr.msra.gmra.mxu1 %v6640_v53 }
 0x41a   :  { %v3655_v41 = vpop.f32.mrf.mxu0  ;;  %v3698_v42 = vpop.f32.mrf.mxu1 }
 0x41b   :  { %v3656_v12 = vadd.f32 %v3655_v41, %v2437_v26 }
 0x41c   :  { %v3657_v43 = vpop.f32.mrf.mxu0  ;;  %v3700_v45 = vpop.f32.mrf.mxu1 }
 0x41d   :  { %v3699_v46 = vadd.f32 %v3698_v42, %v3656_v12  ;;  %v3658_v52 = vadd.f32 %v3657_v43, %v2441_v40 }
 0x41e   :  { %v3659_v50 = vpop.f32.mrf.mxu0  ;;  %v3702_v53 = vpop.f32.mrf.mxu1 }
 0x41f   :  { %v4616_v51 = vmul.f32 -1.442695, %v3699_v46  ;;  %v3701_v55 = vadd.f32 %v3700_v45, %v3658_v52  ;;  %v3660_v56 = vadd.f32 %v3659_v50, %v2437_v26 }
 0x420   :  { %v3661_v57 = vpop.f32.mrf.mxu0  ;;  %v3704_v60 = vpop.f32.mrf.mxu1 }
 0x421   :  { %5412 = vpow2.f32 %v4616_v51  ;;  %v4617_v58 = vmul.f32 -1.442695, %v3701_v55  ;;  %v3703_v59 = vadd.f32 %v3702_v53, %v3660_v56  ;;  %v3662_v6 = vadd.f32 %v3661_v57, %v2441_v40 }
 0x423   :  { %5414 = vpow2.f32 %v4617_v58  ;;  %v4623_v5 = vmul.f32 -1.442695, %v3703_v59  ;;  %v3705_v61 = vadd.f32 %v3704_v60, %v3662_v6 }
 0x425   :  { %5416 = vpow2.f32 %v4623_v5  ;;  %v4624_v62 = vmul.f32 -1.442695, %v3705_v61 }
 0x427   :  { %5418 = vpow2.f32 %v4624_v62 }
 0x42e   :  { %v5413_v63 = vpop.eup %5412 }
 0x42f   :  { %v4003_v0 = vadd.f32 1.0, %v5413_v63 }
 0x430   :  { %v5415_v1 = vpop.eup %5414 }
 0x431   :  { %v4004_v3 = vadd.f32 1.0, %v5415_v1  ;;  %5420 = vrcp.f32 %v4003_v0 }
 0x432   :  { %v5417_v4 = vpop.eup %5416 }
 0x433   :  { %5422 = vrcp.f32 %v4004_v3  ;;  %v4010_v7 = vadd.f32 1.0, %v5417_v4 }
 0x434   :  { %v5419_v9 = vpop.eup %5418 }
 0x435   :  { %v4011_v10 = vadd.f32 1.0, %v5419_v9  ;;  %5424 = vrcp.f32 %v4010_v7 }
 0x437   :  { %5426 = vrcp.f32 %v4011_v10 }
 0x43e   :  { %v5421_v11 = vpop.eup %5420 }
 0x440   :  { %v5423_v14 = vpop.eup %5422 }
 0x441   :  { %v4642_v8 = vpack.c.bf16 %v5423_v14, %v5421_v11 }
 0x442   :  { %v5425_v15 = vpop.eup %5424 }
 0x443   :  { %4089 = vst [vmem:[#allocation2] sm:$0xff] %v4642_v8 }
 0x444   :  { %v5427_v16 = vpop.eup %5426 }
 0x445   :  { %v4646_v17 = vpack.c.bf16 %v5427_v16, %v5425_v15 }
 0x447   :  { %4094 = vst [vmem:[#allocation2 + $0x1c] sm:$0xff] %v4646_v17 }
 0x45a   :  { %v3741_v48 = vpop.f32.mrf.mxu0  ;;  %v3784_v20 = vpop.f32.mrf.mxu1 }
 0x45b   :  { %v3742_v49 = vadd.f32 %v3741_v48, %v2445_v18 }
 0x45c   :  { %v3743_v22 = vpop.f32.mrf.mxu0  ;;  %v3786_v24 = vpop.f32.mrf.mxu1 }
 0x45d   :  { %v3785_v25 = vadd.f32 %v3784_v20, %v3742_v49  ;;  %v3744_v27 = vadd.f32 %v3743_v22, %v2449_v19 }
 0x45e   :  { %v3745_v28 = vpop.f32.mrf.mxu0  ;;  %v3788_v29 = vpop.f32.mrf.mxu1 }
 0x45f   :  { %v4618_v30 = vmul.f32 -1.442695, %v3785_v25  ;;  %v3787_v31 = vadd.f32 %v3786_v24, %v3744_v27  ;;  %v3746_v32 = vadd.f32 %v3745_v28, %v2445_v18 }
 0x460   :  { %v3747_v33 = vpop.f32.mrf.mxu0  ;;  %v3790_v35 = vpop.f32.mrf.mxu1 }
 0x461   :  { %5428 = vpow2.f32 %v4618_v30  ;;  %v4619_v34 = vmul.f32 -1.442695, %v3787_v31  ;;  %v3789_v21 = vadd.f32 %v3788_v29, %v3746_v32  ;;  %v3748_v47 = vadd.f32 %v3747_v33, %v2449_v19 }
 0x463   :  { %5430 = vpow2.f32 %v4619_v34  ;;  %v4625_v44 = vmul.f32 -1.442695, %v3789_v21  ;;  %v3791_v36 = vadd.f32 %v3790_v35, %v3748_v47 }
 0x465   :  { %5432 = vpow2.f32 %v4625_v44  ;;  %v4626_v37 = vmul.f32 -1.442695, %v3791_v36 }
 0x467   :  { %5434 = vpow2.f32 %v4626_v37 }
 0x468   :  { %5479 = shalt.err (!%p5476_p4)
}
 0x469   :  { %s5534_s16 = smov 64   ;;  %s5535_s17 = smov 4  }
 0x46a   :  { %4121 = dma.vmem_to_hbm [thread:$0]  %s4116_s9, 128, %s7165_s11, [#allocation5], %s5534_s16, %s5534_s16, %s5535_s17  }
 0x46b   :  { %s5536_s0 = smov [#allocation6]  }
 0x46c   :  { %s4127_s20 = sshll.u32 %s5536_s0, 4  ;;  %s4128_s20 = int_to_ptr.vmem [resolvable:$true] %s4127_s20 }
 0x46d   :  { %s5488_s21 = scalar_lea.vmem %s4128_s20, 128  ;;  %p5493_p6 = scmp.lt.s32.totalorder %s4128_s20, %s4128_s20 }
 0x46e   :  { %v5429_v13 = vpop.eup %5428  ;;  %p5489_p5 = scmp.ne.s32.totalorder %s4128_s20, %s5488_s21  ;;  %p5494_p7 = scmp.lt.s32.totalorder %s5488_s21, %s5488_s21 }
 0x46f   :  { %v4005_v38 = vadd.f32 1.0, %v5429_v13 }
 0x470   :  { %v5431_v39 = vpop.eup %5430  ;;  %p5495_p8 = por %p5494_p7, %p5493_p6 }
 0x471   :  { %v4006_v54 = vadd.f32 1.0, %v5431_v39 }
 0x472   :  { %p5496_p9 = pnand %p5495_p8, %p5489_p5 }
 0x474   :  { %5499 = shalt.err (!%p5496_p9)
}
 0x475   :  { %4133 = dma.vmem_to_hbm [thread:$0]  %s4128_s20, 128, %s7166_s12, [#allocation5], %s5534_s16, %s5534_s16, %s5535_s17   ;;  %v5433_v26 = vpop.eup %5432  ;;  %5436 = vrcp.f32 %v4005_v38  ;;  %v2452_v53 = vsub.s32 4, %v6363_v2  ;;  %v2456_v51 = vsub.s32 5, %v6363_v2  ;;  %v2460_v24 = vsub.s32 6, %v6363_v2 }
 0x476   :  { %5438 = vrcp.f32 %v4006_v54  ;;  %v4012_v40 = vadd.f32 1.0, %v5433_v26  ;;  %v5435_v41 = vpop.eup %5434  ;;  %vm4092_vm3 = vcmask 125952   ;;  %s5537_s11 = smov [#allocation2]  }
 0x477   :  { %v4013_v42 = vadd.f32 1.0, %v5435_v41  ;;  %v2453_v55 = vrot.slane %v7129_v23, %v2452_v53  ;;  %v2457_v56 = vrot.slane %v7129_v23, %v2456_v51  ;;  %v2461_v28 = vrot.slane %v7129_v23, %v2460_v24  ;;  %s4103_s12 = sshll.u32 %s5537_s11, 4  ;;  %s4104_s12 = int_to_ptr.vmem [resolvable:$true] %s4103_s12 }
 0x478   :  { %5440 = vrcp.f32 %v4012_v40  ;;  %s5508_s24 = scalar_lea.vmem %s4104_s12, 896  ;;  %p5513_p11 = scmp.lt.s32.totalorder %s4104_s12, %s4104_s12 }
 0x479   :  { %5442 = vrcp.f32 %v4013_v42  ;;  %p5509_p10 = scmp.ne.s32.totalorder %s4104_s12, %s5508_s24  ;;  %p5514_p12 = scmp.lt.s32.totalorder %s5508_s24, %s5508_s24 }
 0x47b   :  { %p5515_p13 = por %p5514_p12, %p5513_p11 }
 0x47d   :  { %p5516_p0 = pnand %p5515_p13, %p5509_p10 }
 0x482   :  { %v5437_v12 = vpop.eup %5436 }
 0x483   :  { %v5439_v43 = vpop.eup %5438 }
 0x484   :  { %v4643_v45 = vpack.c.bf16 %v5439_v43, %v5437_v12 }
 0x485   :  { %v5441_v46 = vpop.eup %5440 }
 0x486   :  { %4090 = vst [vmem:[#allocation2 + $0x8] sm:$0xff] %v4643_v45  ;;  %v5443_v52 = vpop.eup %5442 }
 0x487   :  { %v4647_v50 = vpack.c.bf16 %v5443_v52, %v5441_v46 }
 0x489   :  { %4095 = vst [vmem:[#allocation2 + $0x24] sm:$0xff] %v4647_v50 }
 0x49a   :  { %v3827_v57 = vpop.f32.mrf.mxu0 }
 0x49b   :  { %v3828_v58 = vadd.f32 %v3827_v57, %v2453_v55  ;;  %v3870_v59 = vpop.f32.mrf.mxu1 }
 0x49c   :  { %v3829_v6 = vpop.f32.mrf.mxu0 }
 0x49d   :  { %v3871_v60 = vadd.f32 %v3870_v59, %v3828_v58  ;;  %v3830_v5 = vadd.f32 %v3829_v6, %v2457_v56  ;;  %v3872_v61 = vpop.f32.mrf.mxu1 }
 0x49e   :  { %v3831_v62 = vpop.f32.mrf.mxu0 }
 0x49f   :  { %v4620_v63 = vmul.f32 -1.442695, %v3871_v60  ;;  %v3873_v0 = vadd.f32 %v3872_v61, %v3830_v5  ;;  %v3832_v1 = vadd.f32 %v3831_v62, %v2453_v55  ;;  %v3874_v3 = vpop.f32.mrf.mxu1 }
 0x4a0   :  { %v3833_v4 = vpop.f32.mrf.mxu0 }
 0x4a1   :  { %5444 = vpow2.f32 %v4620_v63  ;;  %v4621_v7 = vmul.f32 -1.442695, %v3873_v0  ;;  %v3875_v9 = vadd.f32 %v3874_v3, %v3832_v1  ;;  %v3834_v10 = vadd.f32 %v3833_v4, %v2457_v56  ;;  %v3876_v11 = vpop.f32.mrf.mxu1 }
 0x4a3   :  { %5446 = vpow2.f32 %v4621_v7  ;;  %v4627_v14 = vmul.f32 -1.442695, %v3875_v9  ;;  %v3877_v8 = vadd.f32 %v3876_v11, %v3834_v10 }
 0x4a5   :  { %5448 = vpow2.f32 %v4627_v14  ;;  %v4628_v15 = vmul.f32 -1.442695, %v3877_v8 }
 0x4a7   :  { %5450 = vpow2.f32 %v4628_v15 }
 0x4ae   :  { %v5445_v16 = vpop.eup %5444 }
 0x4af   :  { %v4007_v17 = vadd.f32 1.0, %v5445_v16 }
 0x4b0   :  { %v5447_v18 = vpop.eup %5446 }
 0x4b1   :  { %v4008_v19 = vadd.f32 1.0, %v5447_v18  ;;  %5452 = vrcp.f32 %v4007_v17 }
 0x4b2   :  { %v5449_v48 = vpop.eup %5448 }
 0x4b3   :  { %5454 = vrcp.f32 %v4008_v19  ;;  %v4014_v20 = vadd.f32 1.0, %v5449_v48 }
 0x4b4   :  { %v5451_v49 = vpop.eup %5450 }
 0x4b5   :  { %v4015_v22 = vadd.f32 1.0, %v5451_v49  ;;  %5456 = vrcp.f32 %v4014_v20 }
 0x4b7   :  { %5458 = vrcp.f32 %v4015_v22 }
 0x4ba   :  { %v4710_v25 = vpop.f32.mrf.mxu0 }
 0x4bb   :  { %v4732_v27 = vpop.f32.mrf.mxu1 }
 0x4bc   :  { %v4711_v29 = vpop.f32.mrf.mxu0 }
 0x4bd   :  { %v4712_v30 = vadd.f32 %v4711_v29, %v4710_v25  ;;  %v4733_v31 = vpop.f32.mrf.mxu1 }
 0x4be   :  { %v4713_v32 = vpop.f32.mrf.mxu0  ;;  %v5453_v33 = vpop.eup %5452  ;;  %v4734_v21 = vadd.f32 %v4733_v31, %v4732_v27 }
 0x4bf   :  { %v3914_v34 = vadd.f32 %v4712_v30, %v2461_v28  ;;  %v4735_v47 = vpop.f32.mrf.mxu1 }
 0x4c0   :  { %v5455_v35 = vpop.eup %5454  ;;  %v4714_v44 = vpop.f32.mrf.mxu0 }
 0x4c1   :  { %v4644_v36 = vpack.c.bf16 %v5455_v35, %v5453_v33  ;;  %v3955_v37 = vadd.f32 %v4734_v21, %v3914_v34  ;;  %v4715_v13 = vadd.f32 %v4714_v44, %v4713_v32  ;;  %v4736_v38 = vpop.f32.mrf.mxu1 }
 0x4c2   :  { %v5457_v39 = vpop.eup %5456  ;;  %v4737_v26 = vadd.f32 %v4736_v38, %v4735_v47 }
 0x4c3   :  { %4091 = vst [vmem:[#allocation2 + $0x10] sm:$0xff] %v4644_v36  ;;  %v4622_v2 = vmul.f32 -1.442695, %v3955_v37  ;;  %v3917_v54 = vadd.f32 %v4715_v13, %v2461_v28 }
 0x4c4   :  { %v5459_v23 = vpop.eup %5458 }
 0x4c5   :  { %v4648_v40 = vpack.c.bf16 %v5459_v23, %v5457_v39  ;;  %5460 = vpow2.f32 %v4622_v2  ;;  %v3958_v41 = vadd.f32 %v4737_v26, %v3917_v54 }
 0x4c7   :  { %4096 = vst [vmem:[#allocation2 + $0x2c] sm:$0xff] %v4648_v40  ;;  %v4629_v42 = vmul.f32 -1.442695, %v3958_v41 }
 0x4c9   :  { %5462 = vpow2.f32 %v4629_v42 }
 0x4d2   :  { %v5461_v12 = vpop.eup %5460 }
 0x4d3   :  { %v4009_v43 = vadd.f32 1.0, %v5461_v12 }
 0x4d5   :  { %5464 = vrcp.f32 %v4009_v43 }
 0x4d6   :  { %v5463_v45 = vpop.eup %5462 }
 0x4d7   :  { %v4016_v46 = vadd.f32 1.0, %v5463_v45 }
 0x4d9   :  { %5466 = vrcp.f32 %v4016_v46 }
 0x4e2   :  { %v5465_v52 = vpop.eup %5464 }
 0x4e3   :  { %v4645_v50 = vpack.c.bf16 %v5465_v52, %v5465_v52 }
 0x4e5   :  { %4093 = vst.msk [vmem:[#allocation2 + $0x18] sm:$0xf] %vm4092_vm3, %v4645_v50 }
 0x4e6   :  { %v5467_v53 = vpop.eup %5466 }
 0x4e7   :  { %v4649_v51 = vpack.c.bf16 %v5467_v53, %v5467_v53 }
 0x4e9   :  { %4097 = vst.msk [vmem:[#allocation2 + $0x34] sm:$0xf] %vm4092_vm3, %v4649_v51 }
 0x4ea   :  { %5519 = shalt.err (!%p5516_p0)
}
 0x4eb   :  { %s5538_s6 = smov 448   ;;  %s5539_s3 = smov 28  }
 0x4ec   :  { %4109 = dma.vmem_to_hbm [thread:$0]  %s4104_s12, 896, %s7164_s10, [#allocation3], %s5538_s6, %s5538_s6, %s5539_s3  }
 0x4ed   :  { %5528 = dma.done.wait [#allocation3], 896  }
 0x4ee   :  { %5529 = vsyncadd [#allocation3], 4294966400 }
 0x4ef   :  { %5530 = dma.done.wait [#allocation5], 256  }
 0x4f0   :  { %5531 = vsyncadd [#allocation5], 4294967040 }
 0x4f1   :  { %4143 = vsyncpa [#allocation3], 1 }
 0x4f2   :  { %4144 = vsyncpa [#allocation5], 1 }

</bundles_post_ra>
